<compile_context>
chip_gen: v6e
topology: v6e:2x2x1
jax: 0.10.0
libtpu: 0.0.40
codegen_flags: <defaults>
</compile_context>

<pallas_src>
import functools

import numpy as np
import jax
import jax.numpy as jnp
from jax.experimental import pallas as pl
from jax.experimental.pallas import tpu as pltpu


def _round_up(v, m):
    return (v + m - 1) // m * m


def span_kernel(x_ref, h0_ref, mask_ref,
                w1t_ref, b1_ref, w2t_ref, b2_ref,
                wi_ref, wh_ref, bi_ref, bh_ref,
                st_ref, end_ref):
    """One batch tile.  Row vectors are (Bt, 1, N); contractions are rank3 x rank2 jnp.dot or
    batched rank3 x rank3 einsums (flash patterns) -- no eager f32 copy of x, no reshapes."""
    neg_inf = jnp.float32(-jnp.inf)

    x = x_ref[...]                              # (Bt, Lp, Xp) in its streamed dtype (bf16/f32)
    xdt = x.dtype
    h0 = h0_ref[...]                            # (Bt, 1, Hp) f32
    mask = mask_ref[...]                        # (Bt, 1, Lp) f32; 1.0 == masked (incl. L padding)
    cdt = w1t_ref.dtype                         # MXU operand dtype for the small matmuls (bf16)
    h0c = h0.astype(cdt)

    # ---- BilinearSeqAttn #1 : start scores (contraction runs on the MXU) ----
    wy1 = jnp.dot(h0c, w1t_ref[...], preferred_element_type=jnp.float32) + b1_ref[...]  # (Bt,1,Xp)
    st = jnp.einsum('bqd,bkd->bqk', wy1.astype(xdt), x,
                    preferred_element_type=jnp.float32)                                  # (Bt,1,Lp)
    st = jnp.where(mask > 0, neg_inf, st)
    st_ref[...] = st

    # ---- pointer-network read: softmax(st) @ x ----
    # NOTE: a fully-masked row yields NaN (exp of all -inf), matching the PyTorch reference.
    m = jnp.max(st, axis=-1, keepdims=True)
    e = jnp.exp(st - m)
    p = e * pl.reciprocal(jnp.sum(e, axis=-1, keepdims=True), approx=True)
    ptr = jnp.einsum('bqk,bkd->bqd', p.astype(xdt), x,
                     preferred_element_type=jnp.float32)                                 # (Bt,1,Xp)

    # ---- GRUCell(ptr, h0): two fused MXU matmuls, lane-aligned (128-padded) gate slices ----
    Hp = h0.shape[-1]
    gi = jnp.dot(ptr.astype(cdt), wi_ref[...], preferred_element_type=jnp.float32) + bi_ref[...]
    gh = jnp.dot(h0c, wh_ref[...], preferred_element_type=jnp.float32) + bh_ref[...]
    r = jax.nn.sigmoid(gi[:, :, 0:Hp] + gh[:, :, 0:Hp])
    z = jax.nn.sigmoid(gi[:, :, Hp:2 * Hp] + gh[:, :, Hp:2 * Hp])
    n = jnp.tanh(gi[:, :, 2 * Hp:3 * Hp] + r * gh[:, :, 2 * Hp:3 * Hp])
    h1 = (1.0 - z) * n + z * h0                                                          # (Bt,1,Hp)

    # ---- BilinearSeqAttn #2 : end scores ----
    wy2 = jnp.dot(h1.astype(cdt), w2t_ref[...], preferred_element_type=jnp.float32) + b2_ref[...]
    en = jnp.einsum('bqd,bkd->bqk', wy2.astype(xdt), x,
                    preferred_element_type=jnp.float32)
    end_ref[...] = jnp.where(mask > 0, neg_inf, en)


def prepare_params(params, mxu_dtype=jnp.bfloat16):
    """One-time host-side weight prep: transpose, per-gate split + 128-padding, GRU gate fusion,
    bf16 cast of MXU operands (biases stay f32; they are added after f32 accumulation)."""
    X, H = params["w1"].shape                   # nn.Linear(h_size, x_size): weight (X, H)
    Xp, Hp = _round_up(X, 128), _round_up(H, 128)

    def pad2(a, r, c):
        return jnp.pad(a, ((0, r - a.shape[0]), (0, c - a.shape[1])))

    def padv(v, n):
        return jnp.pad(v, (0, n - v.shape[0]))

    w_ih, w_hh = params["w_ih"], params["w_hh"]          # (3H, X), (3H, H)
    b_ih, b_hh = params["b_ih"], params["b_hh"]          # (3H,), (3H,)

    # Fuse the six GRU matmuls into two: [r | z | n] along the 128-padded output dim.
    wi = jnp.concatenate([pad2(w_ih[g * H:(g + 1) * H].T, Xp, Hp) for g in range(3)], axis=1)
    wh = jnp.concatenate([pad2(w_hh[g * H:(g + 1) * H].T, Hp, Hp) for g in range(3)], axis=1)
    bi = jnp.concatenate([padv(b_ih[0:H] + b_hh[0:H], Hp),          # r: input+hidden bias merged
                          padv(b_ih[H:2 * H] + b_hh[H:2 * H], Hp),  # z: merged
                          padv(b_ih[2 * H:3 * H], Hp)])             # n: input bias only
    bh = jnp.concatenate([jnp.zeros((2 * Hp,), jnp.float32),
                          padv(b_hh[2 * H:3 * H], Hp)])             # n: hidden bias (inside r*(.))

    return {
        "w1t": pad2(params["w1"].T, Hp, Xp).astype(mxu_dtype),      # (Hp, Xp)
        "b1": padv(params["b1"], Xp).reshape(1, 1, Xp).astype(jnp.float32),
        "w2t": pad2(params["w2"].T, Hp, Xp).astype(mxu_dtype),      # (Hp, Xp)
        "b2": padv(params["b2"], Xp).reshape(1, 1, Xp).astype(jnp.float32),
        "wi": wi.astype(mxu_dtype),                                 # (Xp, 3Hp)
        "wh": wh.astype(mxu_dtype),                                 # (Hp, 3Hp)
        "bi": bi.reshape(1, 1, 3 * Hp).astype(jnp.float32),
        "bh": bh.reshape(1, 1, 3 * Hp).astype(jnp.float32),
    }


@functools.partial(jax.jit, static_argnames=("x_dtype",))
def get_span_start_end(x, h0, x_mask, prep, x_dtype=jnp.bfloat16):
    """x:(B,L,X) f32, h0:(B,H) f32, x_mask:(B,L) bool -> (st, end), each (B,L) f32."""
    B, L, X = x.shape
    H = h0.shape[1]
    Lp, Xp, Hp = _round_up(L, 128), _round_up(X, 128), _round_up(H, 128)

    # --- generation-aware VMEM budget (v7x: 64 MiB/core; v5e/v6e: 128 MiB) ---
    try:
        cap = int(getattr(pltpu.get_tpu_info(), "vmem_capacity_bytes", 64 * 2 ** 20))
    except Exception:
        cap = 64 * 2 ** 20                      # conservative fallback (v7x per-core VMEM)
    vmem_limit = max(32 * 2 ** 20, min(cap * 3 // 4, 100 * 2 ** 20))

    itemsize = jnp.dtype(x_dtype).itemsize
    # Resident (constant-index) weights are still double-buffered by the pipeline -> count 2x
    # instead of relying on pipeline_mode=pl.Buffered(1).
    w_bytes = 2 * sum(int(np.prod(a.shape)) * jnp.dtype(a.dtype).itemsize for a in prep.values())
    per_row = (2 * Lp * Xp * itemsize           # double-buffered x tile (kept in streamed dtype)
               + 10 * Lp * 4                    # mask + 2 outputs (2x buffered) + f32 softmax temps
               + 12 * Xp * 4 + 20 * Hp * 4)     # wy/ptr/gate temporaries
    avail = max(vmem_limit - w_bytes - 8 * 2 ** 20, per_row)
    budget_rows = max(1, avail // per_row)

    # --- batch-tile / grid selection ---
    if B <= 8:
        Bt = B                                  # tiny batch: one full-batch tile (block == array)
    else:
        bud8 = max(8, (budget_rows // 8) * 8)   # sublane-aligned row budget (no silent overshoot)
        n_tiles = max(2, pl.cdiv(B, bud8))      # >= 2 grid steps: feeds both v7x TCs + pipelining
        Bt = _round_up(pl.cdiv(B, n_tiles), 8)
    Bp = _round_up(B, Bt)
    grid = (Bp // Bt,)
    # TODO(synk): for very long contexts where even 8 rows exceed the budget, add an L-tiled
    # online-softmax (flash-style) second grid axis instead of shrinking the batch tile further.

    # --- inputs: pad only what actually needs padding (avoid the ~3x HBM rewrite of x) ---
    if L == Lp and X == Xp and B == Bp and x.dtype == jnp.dtype(x_dtype):
        x_p = x
    else:
        x_p = jnp.zeros((Bp, Lp, Xp), x_dtype).at[:B, :L, :X].set(x.astype(x_dtype))
    h0_p = jnp.zeros((Bp, 1, Hp), jnp.float32).at[:B, 0, :H].set(h0)
    mask_p = (jnp.zeros((Bp, 1, Lp), jnp.float32)
              .at[:B, 0, L:].set(1.0)                       # mask the L padding of real rows
              .at[:B, 0, :L].set(x_mask.astype(jnp.float32)))

    def resident(shape):                        # weights: constant block index -> stay in VMEM
        nd = len(shape)
        return pl.BlockSpec(shape, lambda i, _n=nd: (0,) * _n)

    in_specs = [
        pl.BlockSpec((Bt, Lp, Xp), lambda i: (i, 0, 0)),    # x (streamed dtype, no in-kernel copy)
        pl.BlockSpec((Bt, 1, Hp), lambda i: (i, 0, 0)),     # h0
        pl.BlockSpec((Bt, 1, Lp), lambda i: (i, 0, 0)),     # mask
        resident((Hp, Xp)), resident((1, 1, Xp)),           # w1t, b1
        resident((Hp, Xp)), resident((1, 1, Xp)),           # w2t, b2
        resident((Xp, 3 * Hp)), resident((Hp, 3 * Hp)),     # wi, wh (fused GRU gates)
        resident((1, 1, 3 * Hp)), resident((1, 1, 3 * Hp)),  # bi, bh
    ]
    out_specs = (pl.BlockSpec((Bt, 1, Lp), lambda i: (i, 0, 0)),
                 pl.BlockSpec((Bt, 1, Lp), lambda i: (i, 0, 0)))
    out_shape = (jax.ShapeDtypeStruct((Bp, 1, Lp), jnp.float32),
                 jax.ShapeDtypeStruct((Bp, 1, Lp), jnp.float32))

    st_p, en_p = pl.pallas_call(
        span_kernel,
        grid=grid,
        in_specs=in_specs,
        out_specs=out_specs,
        out_shape=out_shape,
        compiler_params=pltpu.CompilerParams(
            dimension_semantics=("parallel",),
            vmem_limit_bytes=int(vmem_limit),
        ),
    )(x_p, h0_p, mask_p,
      prep["w1t"], prep["b1"], prep["w2t"], prep["b2"],
      prep["wi"], prep["wh"], prep["bi"], prep["bh"])

    return st_p[:B, 0, :L], en_p[:B, 0, :L]


def reference_jax(x, h0, x_mask, params):
    """Pure-JAX reference mirroring the PyTorch module (eval mode)."""
    neg_inf = -jnp.inf
    wy1 = h0 @ params["w1"].T + params["b1"]
    st = jnp.einsum('blx,bx->bl', x, wy1)
    st = jnp.where(x_mask, neg_inf, st)
    p = jax.nn.softmax(st, axis=1)
    ptr = jnp.einsum('bl,blx->bx', p, x)
    H = h0.shape[1]
    gi = ptr @ params["w_ih"].T + params["b_ih"]
    gh = h0 @ params["w_hh"].T + params["b_hh"]
    r = jax.nn.sigmoid(gi[:, :H] + gh[:, :H])
    z = jax.nn.sigmoid(gi[:, H:2 * H] + gh[:, H:2 * H])
    n = jnp.tanh(gi[:, 2 * H:] + r * gh[:, 2 * H:])
    h1 = (1 - z) * n + z * h0
    wy2 = h1 @ params["w2"].T + params["b2"]
    en = jnp.einsum('blx,bx->bl', x, wy2)
    en = jnp.where(x_mask, neg_inf, en)
    return st, en


if __name__ == "__main__":
    B, L, X, H = 2, 8, 32, 32   # batch, seq len, x_size, h_size

    key = jax.random.PRNGKey(0)
    ks = jax.random.split(key, 10)

    x = jax.random.normal(ks[0], (B, L, X), dtype=jnp.float32)
    h0 = jax.random.normal(ks[1], (B, H), dtype=jnp.float32)
    # Mask out the last two positions of batch element 1 (never a full row).
    x_mask = jnp.zeros((B, L), dtype=bool).at[1, L - 2:].set(True)

    s = 0.1
    params = {
        "w1": s * jax.random.normal(ks[2], (X, H), dtype=jnp.float32),
        "b1": s * jax.random.normal(ks[3], (X,), dtype=jnp.float32),
        "w2": s * jax.random.normal(ks[4], (X, H), dtype=jnp.float32),
        "b2": s * jax.random.normal(ks[5], (X,), dtype=jnp.float32),
        "w_ih": s * jax.random.normal(ks[6], (3 * H, X), dtype=jnp.float32),
        "w_hh": s * jax.random.normal(ks[7], (3 * H, H), dtype=jnp.float32),
        "b_ih": s * jax.random.normal(ks[8], (3 * H,), dtype=jnp.float32),
        "b_hh": s * jax.random.normal(ks[9], (3 * H,), dtype=jnp.float32),
    }

    prep = prepare_params(params)                       # one-time weight prep (hoisted)
    st_ref, en_ref = reference_jax(x, h0, x_mask, params)

    # Tolerances are loose because all MXU operands are bf16 per the perf review
    # (f32 accumulation); the structural -inf mask checks below are exact.
    TOL = dict(atol=1e-1, rtol=1e-1)

    # f32 HBM-transfer path (x streamed as f32; weights/matmul operands bf16).
    st, en = get_span_start_end(x, h0, x_mask, prep, x_dtype=jnp.float32)
    jax.block_until_ready((st, en))
    assert st.shape == (B, L) and en.shape == (B, L)
    assert np.allclose(np.asarray(st), np.asarray(st_ref), **TOL)
    assert np.allclose(np.asarray(en), np.asarray(en_ref), **TOL)
    assert np.all(np.isneginf(np.asarray(st)[1, L - 2:]))
    assert np.all(np.isneginf(np.asarray(en)[1, L - 2:]))

    # bf16 HBM-transfer path (halves x bandwidth; f32 accumulation inside the kernel).
    st16, en16 = get_span_start_end(x, h0, x_mask, prep, x_dtype=jnp.bfloat16)
    jax.block_until_ready((st16, en16))
    assert np.allclose(np.asarray(st16), np.asarray(st_ref), **TOL)
    assert np.allclose(np.asarray(en16), np.asarray(en_ref), **TOL)
    assert np.all(np.isneginf(np.asarray(st16)[1, L - 2:]))
    assert np.all(np.isneginf(np.asarray(en16)[1, L - 2:]))

    print("KERNEL_OK")
</pallas_src>

<mosaic_0001>
module attributes {stable_mosaic.version = 11 : i64} {
  func.func @span_kernel(%arg0: i32, %arg1: memref<2x128x128xf32, #tpu.memory_space<vmem>>, %arg2: memref<2x1x128xf32, #tpu.memory_space<vmem>>, %arg3: memref<2x1x128xf32, #tpu.memory_space<vmem>>, %arg4: memref<128x128xbf16, #tpu.memory_space<vmem>>, %arg5: memref<1x1x128xf32, #tpu.memory_space<vmem>>, %arg6: memref<128x128xbf16, #tpu.memory_space<vmem>>, %arg7: memref<1x1x128xf32, #tpu.memory_space<vmem>>, %arg8: memref<128x384xbf16, #tpu.memory_space<vmem>>, %arg9: memref<128x384xbf16, #tpu.memory_space<vmem>>, %arg10: memref<1x1x384xf32, #tpu.memory_space<vmem>>, %arg11: memref<1x1x384xf32, #tpu.memory_space<vmem>>, %arg12: memref<2x1x128xf32, #tpu.memory_space<vmem>>, %arg13: memref<2x1x128xf32, #tpu.memory_space<vmem>>) attributes {dimension_semantics = [#tpu.dimension_semantics<parallel>], iteration_bounds = array<i64: 1>, scalar_prefetch = 0 : i64, scratch_operands = 0 : i64, tpu.core_type = #tpu.core_type<tc>, window_params = [{transform_indices = @transform_0, window_bounds = array<i64: 2, 128, 128>}, {transform_indices = @transform_1, window_bounds = array<i64: 2, 1, 128>}, {transform_indices = @transform_2, window_bounds = array<i64: 2, 1, 128>}, {pipeline_mode = #tpu.pipeline_mode<synchronous>, transform_indices = @transform_3, window_bounds = array<i64: 128, 128>}, {pipeline_mode = #tpu.pipeline_mode<synchronous>, transform_indices = @transform_4, window_bounds = array<i64: 1, 1, 128>}, {pipeline_mode = #tpu.pipeline_mode<synchronous>, transform_indices = @transform_5, window_bounds = array<i64: 128, 128>}, {pipeline_mode = #tpu.pipeline_mode<synchronous>, transform_indices = @transform_6, window_bounds = array<i64: 1, 1, 128>}, {pipeline_mode = #tpu.pipeline_mode<synchronous>, transform_indices = @transform_7, window_bounds = array<i64: 128, 384>}, {pipeline_mode = #tpu.pipeline_mode<synchronous>, transform_indices = @transform_8, window_bounds = array<i64: 128, 384>}, {pipeline_mode = #tpu.pipeline_mode<synchronous>, transform_indices = @transform_9, window_bounds = array<i64: 1, 1, 384>}, {pipeline_mode = #tpu.pipeline_mode<synchronous>, transform_indices = @transform_10, window_bounds = array<i64: 1, 1, 384>}, {transform_indices = @transform_11, window_bounds = array<i64: 2, 1, 128>}, {transform_indices = @transform_12, window_bounds = array<i64: 2, 1, 128>}]} {
    %c0 = arith.constant 0 : index
    %c0_0 = arith.constant 0 : index
    %c0_1 = arith.constant 0 : index
    %0 = vector.load %arg1[%c0, %c0_0, %c0_1] : memref<2x128x128xf32, #tpu.memory_space<vmem>>, vector<2x128x128xf32>
    %c0_2 = arith.constant 0 : index
    %c0_3 = arith.constant 0 : index
    %c0_4 = arith.constant 0 : index
    %1 = vector.load %arg2[%c0_2, %c0_3, %c0_4] : memref<2x1x128xf32, #tpu.memory_space<vmem>>, vector<2x1x128xf32>
    %c0_5 = arith.constant 0 : index
    %c0_6 = arith.constant 0 : index
    %c0_7 = arith.constant 0 : index
    %2 = vector.load %arg3[%c0_5, %c0_6, %c0_7] : memref<2x1x128xf32, #tpu.memory_space<vmem>>, vector<2x1x128xf32>
    %3 = arith.truncf %1 : vector<2x1x128xf32> to vector<2x1x128xbf16>
    %c0_8 = arith.constant 0 : index
    %c0_9 = arith.constant 0 : index
    %4 = vector.load %arg4[%c0_8, %c0_9] : memref<128x128xbf16, #tpu.memory_space<vmem>>, vector<128x128xbf16>
    %cst = arith.constant dense<0.000000e+00> : vector<2x1x128xf32>
    %5 = tpu.matmul %3, %4, %cst {dimension_numbers = #tpu.dot_dimension_numbers<[2], [0], [0, 1], [1], [0, 0, 0, 1, 1, 1], [], []>} : vector<2x1x128xbf16>, vector<128x128xbf16>, vector<2x1x128xf32> -> vector<2x1x128xf32>
    %c0_10 = arith.constant 0 : index
    %c0_11 = arith.constant 0 : index
    %c0_12 = arith.constant 0 : index
    %6 = vector.load %arg5[%c0_10, %c0_11, %c0_12] : memref<1x1x128xf32, #tpu.memory_space<vmem>>, vector<1x1x128xf32>
    %7 = vector.broadcast %6 : vector<1x1x128xf32> to vector<2x1x128xf32>
    %8 = arith.addf %5, %7 : vector<2x1x128xf32>
    "tpu.trace_start"() <{level = 10 : i32, message = "bqd,bkd->bqk"}> : () -> ()
    %cst_13 = arith.constant dense<0.000000e+00> : vector<2x1x128xf32>
    %9 = tpu.matmul %8, %0, %cst_13 {dimension_numbers = #tpu.dot_dimension_numbers<[2], [2], [1], [1], [0, 0, 0, 1, 1, 1], [0], [0]>} : vector<2x1x128xf32>, vector<2x128x128xf32>, vector<2x1x128xf32> -> vector<2x1x128xf32>
    %cst_14 = arith.constant 0.000000e+00 : f32
    "tpu.trace_stop"() : () -> ()
    %10 = vector.broadcast %cst_14 : f32 to vector<2x1x128xf32>
    %11 = arith.cmpf ogt, %2, %10 : vector<2x1x128xf32>
    %cst_15 = arith.constant 0xFF800000 : f32
    %12 = vector.broadcast %cst_15 : f32 to vector<2x1x128xf32>
    %13 = arith.select %11, %12, %9 : vector<2x1x128xi1>, vector<2x1x128xf32>
    %c0_16 = arith.constant 0 : index
    %c0_17 = arith.constant 0 : index
    %c0_18 = arith.constant 0 : index
    %14 = vector.load %arg12[%c0_16, %c0_17, %c0_18] : memref<2x1x128xf32, #tpu.memory_space<vmem>>, vector<2x1x128xf32>
    tpu.vector_store %arg12[%c0_16, %c0_17, %c0_18], %13 {strides = array<i32>} : memref<2x1x128xf32, #tpu.memory_space<vmem>>, vector<2x1x128xf32>,
    %cst_19 = arith.constant dense<0xFF800000> : vector<2x1xf32>
    %15 = vector.multi_reduction <maximumf>, %13, %cst_19 [2] : vector<2x1x128xf32> to vector<2x1xf32>
    %16 = vector.shape_cast %15 : vector<2x1xf32> to vector<2x1x1xf32>
    %17 = vector.broadcast %16 : vector<2x1x1xf32> to vector<2x1x128xf32>
    %18 = arith.subf %13, %17 : vector<2x1x128xf32>
    %19 = math.exp %18 : vector<2x1x128xf32>
    %cst_20 = arith.constant dense<0.000000e+00> : vector<2x1xf32>
    %20 = vector.multi_reduction <add>, %19, %cst_20 [2] : vector<2x1x128xf32> to vector<2x1xf32>
    %21 = vector.shape_cast %20 : vector<2x1xf32> to vector<2x1x1xf32>
    %22 = tpu.reciprocal %21 {approx = true} : vector<2x1x1xf32> -> vector<2x1x1xf32>
    %23 = vector.broadcast %22 : vector<2x1x1xf32> to vector<2x1x128xf32>
    %24 = arith.mulf %19, %23 : vector<2x1x128xf32>
    "tpu.trace_start"() <{level = 10 : i32, message = "bqk,bkd->bqd"}> : () -> ()
    %cst_21 = arith.constant dense<0.000000e+00> : vector<2x1x128xf32>
    %25 = tpu.matmul %24, %0, %cst_21 {dimension_numbers = #tpu.dot_dimension_numbers<[2], [1], [1], [2], [0, 0, 0, 1, 1, 2], [0], [0]>} : vector<2x1x128xf32>, vector<2x128x128xf32>, vector<2x1x128xf32> -> vector<2x1x128xf32>
    "tpu.trace_stop"() : () -> ()
    %26 = arith.truncf %25 : vector<2x1x128xf32> to vector<2x1x128xbf16>
    %c0_22 = arith.constant 0 : index
    %c0_23 = arith.constant 0 : index
    %27 = vector.load %arg8[%c0_22, %c0_23] : memref<128x384xbf16, #tpu.memory_space<vmem>>, vector<128x384xbf16>
    %cst_24 = arith.constant dense<0.000000e+00> : vector<2x1x384xf32>
    %28 = tpu.matmul %26, %27, %cst_24 {dimension_numbers = #tpu.dot_dimension_numbers<[2], [0], [0, 1], [1], [0, 0, 0, 1, 1, 1], [], []>} : vector<2x1x128xbf16>, vector<128x384xbf16>, vector<2x1x384xf32> -> vector<2x1x384xf32>
    %c0_25 = arith.constant 0 : index
    %c0_26 = arith.constant 0 : index
    %c0_27 = arith.constant 0 : index
    %29 = vector.load %arg10[%c0_25, %c0_26, %c0_27] : memref<1x1x384xf32, #tpu.memory_space<vmem>>, vector<1x1x384xf32>
    %30 = vector.broadcast %29 : vector<1x1x384xf32> to vector<2x1x384xf32>
    %31 = arith.addf %28, %30 : vector<2x1x384xf32>
    %c0_28 = arith.constant 0 : index
    %c0_29 = arith.constant 0 : index
    %32 = vector.load %arg9[%c0_28, %c0_29] : memref<128x384xbf16, #tpu.memory_space<vmem>>, vector<128x384xbf16>
    %cst_30 = arith.constant dense<0.000000e+00> : vector<2x1x384xf32>
    %33 = tpu.matmul %3, %32, %cst_30 {dimension_numbers = #tpu.dot_dimension_numbers<[2], [0], [0, 1], [1], [0, 0, 0, 1, 1, 1], [], []>} : vector<2x1x128xbf16>, vector<128x384xbf16>, vector<2x1x384xf32> -> vector<2x1x384xf32>
    %c0_31 = arith.constant 0 : index
    %c0_32 = arith.constant 0 : index
    %c0_33 = arith.constant 0 : index
    %34 = vector.load %arg11[%c0_31, %c0_32, %c0_33] : memref<1x1x384xf32, #tpu.memory_space<vmem>>, vector<1x1x384xf32>
    %35 = vector.broadcast %34 : vector<1x1x384xf32> to vector<2x1x384xf32>
    %36 = arith.addf %33, %35 : vector<2x1x384xf32>
    %37 = vector.extract_strided_slice %31 {offsets = [0, 0, 0], sizes = [2, 1, 128], strides = [1, 1, 1]} : vector<2x1x384xf32> to vector<2x1x128xf32>
    %38 = vector.extract_strided_slice %36 {offsets = [0, 0, 0], sizes = [2, 1, 128], strides = [1, 1, 1]} : vector<2x1x384xf32> to vector<2x1x128xf32>
    %39 = arith.addf %37, %38 : vector<2x1x128xf32>
    %40 = arith.negf %39 : vector<2x1x128xf32>
    %41 = math.exp %40 : vector<2x1x128xf32>
    %cst_34 = arith.constant 1.000000e+00 : f32
    %42 = vector.broadcast %cst_34 : f32 to vector<2x1x128xf32>
    %43 = arith.addf %42, %41 : vector<2x1x128xf32>
    %44 = arith.divf %42, %43 : vector<2x1x128xf32>
    %45 = vector.extract_strided_slice %31 {offsets = [0, 0, 128], sizes = [2, 1, 128], strides = [1, 1, 1]} : vector<2x1x384xf32> to vector<2x1x128xf32>
    %46 = vector.extract_strided_slice %36 {offsets = [0, 0, 128], sizes = [2, 1, 128], strides = [1, 1, 1]} : vector<2x1x384xf32> to vector<2x1x128xf32>
    %47 = arith.addf %45, %46 : vector<2x1x128xf32>
    %48 = arith.negf %47 : vector<2x1x128xf32>
    %49 = math.exp %48 : vector<2x1x128xf32>
    %cst_35 = arith.constant 1.000000e+00 : f32
    %50 = vector.broadcast %cst_35 : f32 to vector<2x1x128xf32>
    %51 = arith.addf %50, %49 : vector<2x1x128xf32>
    %52 = arith.divf %50, %51 : vector<2x1x128xf32>
    %53 = vector.extract_strided_slice %31 {offsets = [0, 0, 256], sizes = [2, 1, 128], strides = [1, 1, 1]} : vector<2x1x384xf32> to vector<2x1x128xf32>
    %54 = vector.extract_strided_slice %36 {offsets = [0, 0, 256], sizes = [2, 1, 128], strides = [1, 1, 1]} : vector<2x1x384xf32> to vector<2x1x128xf32>
    %55 = arith.mulf %44, %54 : vector<2x1x128xf32>
    %56 = arith.addf %53, %55 : vector<2x1x128xf32>
    %57 = math.tanh %56 : vector<2x1x128xf32>
    %cst_36 = arith.constant 1.000000e+00 : f32
    %58 = vector.broadcast %cst_36 : f32 to vector<2x1x128xf32>
    %59 = arith.subf %58, %52 : vector<2x1x128xf32>
    %60 = arith.mulf %59, %57 : vector<2x1x128xf32>
    %61 = arith.mulf %52, %1 : vector<2x1x128xf32>
    %62 = arith.addf %60, %61 : vector<2x1x128xf32>
    %63 = arith.truncf %62 : vector<2x1x128xf32> to vector<2x1x128xbf16>
    %c0_37 = arith.constant 0 : index
    %c0_38 = arith.constant 0 : index
    %64 = vector.load %arg6[%c0_37, %c0_38] : memref<128x128xbf16, #tpu.memory_space<vmem>>, vector<128x128xbf16>
    %cst_39 = arith.constant dense<0.000000e+00> : vector<2x1x128xf32>
    %65 = tpu.matmul %63, %64, %cst_39 {dimension_numbers = #tpu.dot_dimension_numbers<[2], [0], [0, 1], [1], [0, 0, 0, 1, 1, 1], [], []>} : vector<2x1x128xbf16>, vector<128x128xbf16>, vector<2x1x128xf32> -> vector<2x1x128xf32>
    %c0_40 = arith.constant 0 : index
    %c0_41 = arith.constant 0 : index
    %c0_42 = arith.constant 0 : index
    %66 = vector.load %arg7[%c0_40, %c0_41, %c0_42] : memref<1x1x128xf32, #tpu.memory_space<vmem>>, vector<1x1x128xf32>
    %67 = vector.broadcast %66 : vector<1x1x128xf32> to vector<2x1x128xf32>
    %68 = arith.addf %65, %67 : vector<2x1x128xf32>
    "tpu.trace_start"() <{level = 10 : i32, message = "bqd,bkd->bqk"}> : () -> ()
    %cst_43 = arith.constant dense<0.000000e+00> : vector<2x1x128xf32>
    %69 = tpu.matmul %68, %0, %cst_43 {dimension_numbers = #tpu.dot_dimension_numbers<[2], [2], [1], [1], [0, 0, 0, 1, 1, 1], [0], [0]>} : vector<2x1x128xf32>, vector<2x128x128xf32>, vector<2x1x128xf32> -> vector<2x1x128xf32>
    %cst_44 = arith.constant 0.000000e+00 : f32
    "tpu.trace_stop"() : () -> ()
    %70 = vector.broadcast %cst_44 : f32 to vector<2x1x128xf32>
    %71 = arith.cmpf ogt, %2, %70 : vector<2x1x128xf32>
    %cst_45 = arith.constant 0xFF800000 : f32
    %72 = vector.broadcast %cst_45 : f32 to vector<2x1x128xf32>
    %73 = arith.select %71, %72, %69 : vector<2x1x128xi1>, vector<2x1x128xf32>
    %c0_46 = arith.constant 0 : index
    %c0_47 = arith.constant 0 : index
    %c0_48 = arith.constant 0 : index
    %74 = vector.load %arg13[%c0_46, %c0_47, %c0_48] : memref<2x1x128xf32, #tpu.memory_space<vmem>>, vector<2x1x128xf32>
    tpu.vector_store %arg13[%c0_46, %c0_47, %c0_48], %73 {strides = array<i32>} : memref<2x1x128xf32, #tpu.memory_space<vmem>>, vector<2x1x128xf32>,
    return
  }
  func.func @transform_0(%arg0: i32) -> (i32, i32, i32) {
    %c0_i32 = arith.constant 0 : i32
    %c0_i32_0 = arith.constant 0 : i32
    %c0_i32_1 = arith.constant 0 : i32
    return %arg0, %c0_i32, %c0_i32_0 : i32, i32, i32
  }
  func.func @transform_1(%arg0: i32) -> (i32, i32, i32) {
    %c0_i32 = arith.constant 0 : i32
    %c0_i32_0 = arith.constant 0 : i32
    %c0_i32_1 = arith.constant 0 : i32
    return %arg0, %c0_i32, %c0_i32_0 : i32, i32, i32
  }
  func.func @transform_2(%arg0: i32) -> (i32, i32, i32) {
    %c0_i32 = arith.constant 0 : i32
    %c0_i32_0 = arith.constant 0 : i32
    %c0_i32_1 = arith.constant 0 : i32
    return %arg0, %c0_i32, %c0_i32_0 : i32, i32, i32
  }
  func.func @transform_3(%arg0: i32) -> (i32, i32) {
    %c0_i32 = arith.constant 0 : i32
    %c0_i32_0 = arith.constant 0 : i32
    %c0_i32_1 = arith.constant 0 : i32
    return %c0_i32, %c0_i32_0 : i32, i32
  }
  func.func @transform_4(%arg0: i32) -> (i32, i32, i32) {
    %c0_i32 = arith.constant 0 : i32
    %c0_i32_0 = arith.constant 0 : i32
    %c0_i32_1 = arith.constant 0 : i32
    %c0_i32_2 = arith.constant 0 : i32
    return %c0_i32, %c0_i32_0, %c0_i32_1 : i32, i32, i32
  }
  func.func @transform_5(%arg0: i32) -> (i32, i32) {
    %c0_i32 = arith.constant 0 : i32
    %c0_i32_0 = arith.constant 0 : i32
    %c0_i32_1 = arith.constant 0 : i32
    return %c0_i32, %c0_i32_0 : i32, i32
  }
  func.func @transform_6(%arg0: i32) -> (i32, i32, i32) {
    %c0_i32 = arith.constant 0 : i32
    %c0_i32_0 = arith.constant 0 : i32
    %c0_i32_1 = arith.constant 0 : i32
    %c0_i32_2 = arith.constant 0 : i32
    return %c0_i32, %c0_i32_0, %c0_i32_1 : i32, i32, i32
  }
  func.func @transform_7(%arg0: i32) -> (i32, i32) {
    %c0_i32 = arith.constant 0 : i32
    %c0_i32_0 = arith.constant 0 : i32
    %c0_i32_1 = arith.constant 0 : i32
    return %c0_i32, %c0_i32_0 : i32, i32
  }
  func.func @transform_8(%arg0: i32) -> (i32, i32) {
    %c0_i32 = arith.constant 0 : i32
    %c0_i32_0 = arith.constant 0 : i32
    %c0_i32_1 = arith.constant 0 : i32
    return %c0_i32, %c0_i32_0 : i32, i32
  }
  func.func @transform_9(%arg0: i32) -> (i32, i32, i32) {
    %c0_i32 = arith.constant 0 : i32
    %c0_i32_0 = arith.constant 0 : i32
    %c0_i32_1 = arith.constant 0 : i32
    %c0_i32_2 = arith.constant 0 : i32
    return %c0_i32, %c0_i32_0, %c0_i32_1 : i32, i32, i32
  }
  func.func @transform_10(%arg0: i32) -> (i32, i32, i32) {
    %c0_i32 = arith.constant 0 : i32
    %c0_i32_0 = arith.constant 0 : i32
    %c0_i32_1 = arith.constant 0 : i32
    %c0_i32_2 = arith.constant 0 : i32
    return %c0_i32, %c0_i32_0, %c0_i32_1 : i32, i32, i32
  }
  func.func @transform_11(%arg0: i32) -> (i32, i32, i32) {
    %c0_i32 = arith.constant 0 : i32
    %c0_i32_0 = arith.constant 0 : i32
    %c0_i32_1 = arith.constant 0 : i32
    return %arg0, %c0_i32, %c0_i32_0 : i32, i32, i32
  }
  func.func @transform_12(%arg0: i32) -> (i32, i32, i32) {
    %c0_i32 = arith.constant 0 : i32
    %c0_i32_0 = arith.constant 0 : i32
    %c0_i32_1 = arith.constant 0 : i32
    return %arg0, %c0_i32, %c0_i32_0 : i32, i32, i32
  }
}

</mosaic_0001>

<bundles_post_ra>
// kernel: get_span_start_end.1
= control target key start
LH: loop header
LB: loop body
LE: loop exit
PB: predicated region body
PF: predicated region fallthrough
CT: control target
= control target key end

     0   :  { %18 = vsyncpa [#allocation3], 0  ;;  %s2961_s0 = inlined_call_operand.vmem [shape: f32[2,128,128], index: 0, kind: input, shape index: {}]   ;;  %s2962_s1 = inlined_call_operand.vmem [shape: f32[2,1,128], index: 1, kind: input, shape index: {}]   ;;  %s2963_s2 = inlined_call_operand.vmem [shape: f32[2,1,128], index: 2, kind: input, shape index: {}]   ;;  %s2964_s3 = inlined_call_operand.vmem [shape: bf16[128,128], index: 3, kind: input, shape index: {}]   ;;  %s2965_s4 = inlined_call_operand.vmem [shape: f32[1,1,128], index: 4, kind: input, shape index: {}]   ;;  %s2966_s5 = inlined_call_operand.vmem [shape: bf16[128,128], index: 5, kind: input, shape index: {}]   ;;  %s2967_s6 = inlined_call_operand.vmem [shape: f32[1,1,128], index: 6, kind: input, shape index: {}]   ;;  %s2968_s7 = inlined_call_operand.vmem [shape: bf16[128,384], index: 7, kind: input, shape index: {}]   ;;  %s2969_s8 = inlined_call_operand.hbm [shape: bf16[128,384], index: 8, kind: input, shape index: {}]   ;;  %s2970_s9 = inlined_call_operand.vmem [shape: f32[1,1,384], index: 9, kind: input, shape index: {}]   ;;  %s2971_s10 = inlined_call_operand.vmem [shape: f32[1,1,384], index: 10, kind: input, shape index: {}]   ;;  %s2972_s11 = inlined_call_operand.hbm [shape: f32[2,1,128], index: 11, kind: output, shape index: {0}]   ;;  %s2973_s12 = inlined_call_operand.hbm [shape: f32[2,1,128], index: 12, kind: output, shape index: {1}]  }
   0x1   :  { %19 = vsyncpa [#allocation4], 0 }
   0x2   :  { %20 = vsyncpa [#allocation7], 0  ;;  %s2264_s21 = smov [#allocation2]  }
   0x3   :  { %s42_s22 = sshll.u32 %s2264_s21, 4  ;;  %s43_s22 = int_to_ptr.vmem [resolvable:$true] %s42_s22 }
   0x4   :  { %s2206_s23 = scalar_lea.vmem %s43_s22, 3072  ;;  %p2211_p1 = scmp.lt.s32.totalorder %s43_s22, %s43_s22 }
   0x5   :  { %p2207_p0 = scmp.ne.s32.totalorder %s43_s22, %s2206_s23  ;;  %p2212_p2 = scmp.lt.s32.totalorder %s2206_s23, %s2206_s23 }
   0x7   :  { %p2213_p3 = por %p2212_p2, %p2211_p1 }
   0x9   :  { %p2214_p4 = pnand %p2213_p3, %p2207_p0 }
   0xb   :  { %2217 = shalt.err (!%p2214_p4)
}
   0xc   :  { %s2265_s24 = smov 192   ;;  %s2266_s25 = smov 12  }
   0xd   :  { %48 = dma.hbm_to_vmem [thread:$0]  %s2969_s8, 3072, %s43_s22, [#allocation3], %s2265_s24, %s2265_s24, %s2266_s25  }
   0xe   :  { %2258 = dma.done.wait [#allocation3], 3072  }
   0xf   :  { %2259 = vsyncadd [#allocation3], 4294964224  ;;  %v2267_v0 = vmov 0.0   ;;  %vm2268_vm0 = vmmov 0   ;;  %v2081_v1 = vld [vmem:[%s2964_s3 + $0x38] sm:$0xff]   ;;  %v2082_v2 = vld [vmem:[%s2964_s3 + $0x30] sm:$0xff]   ;;  %v174_v52 = vlaneseq }
  0x10   :  { %1780 = vmatprep.subr.bf16.mxu0 %v2267_v0  ;;  %1796 = vmatprep.mubr.msk.bf16.mxu0 %vm2268_vm0, %v2267_v0  ;;  %v2083_v3 = vld [vmem:[%s2964_s3 + $0x28] sm:$0xff]   ;;  %v2363_v4 = vld [vmem:[%s2961_s0 + $0x78] sm:$0xff]  ;;  %v2084_v5 = vld [vmem:[%s2964_s3 + $0x20] sm:$0xff]   ;;  %vm117_vm1 = vcmask 1041409   ;;  %v2269_v50 = vmov 1966171168  }
  0x11   :  { %1800 = vmatprep.subr.mxu1 %v2267_v0  ;;  %1832 = vmatprep.mubr.msk.f32.mxu1 %vm2268_vm0, %v2267_v0  ;;  %v2373_v6 = vld [vmem:[%s2961_s0 + $0x70] sm:$0xff]  ;;  %v90_v7 = vld [vmem:[%s2962_s1 + $0x1] sm:$0x1]  ;;  %v2085_v8 = vld [vmem:[%s2964_s3 + $0x18] sm:$0xff]   ;;  %v172_v51 = vunpack.c.l.s4 %v2269_v50  ;;  %v175_v54 = vshrl.u32 %v174_v52, 7  ;;  %vm397_vm4 = vcmask 1040384  }
  0x12   :  { %1781 = vmatpush3.bf16.msra.mxu0 %v2081_v1  ;;  %1801 = vmatpush3.xpose.msra.mxu1 %v2363_v4  ;;  %v94_v9 = vpack.c.bf16 %v90_v7, %v90_v7  ;;  %v2387_v10 = vld [vmem:[%s2961_s0 + $0x68] sm:$0xff]  ;;  %v89_v11 = vld [vmem:[%s2962_s1] sm:$0x1]  ;;  %v2086_v12 = vld [vmem:[%s2964_s3 + $0x10] sm:$0xff]   ;;  %s2271_s24 = smov [#allocation5]  }
  0x13   :  { %1782 = vmatprep.subr.bf16.mxu0 %v2267_v0  ;;  %1802 = vmatprep.subr.mxu1 %v2267_v0  ;;  %v93_v13 = vpack.c.bf16 %v89_v11, %v89_v11  ;;  %v2401_v15 = vld [vmem:[%s2961_s0 + $0x60] sm:$0xff]  ;;  %v2087_v16 = vld [vmem:[%s2964_s3 + $0x8] sm:$0xff]   ;;  %v2410_v17 = vld [vmem:[%s2961_s0 + $0x58] sm:$0xff]  ;;  %v173_v53 = vunpack.c.0.s8 %v172_v51 }
  0x14   :  { %v115_v14 = vunpack.c.l.b16 %v94_v9  ;;  %v2088_v20 = vld [vmem:[%s2964_s3] sm:$0xff]   ;;  %v2421_v21 = vld [vmem:[%s2961_s0 + $0x50] sm:$0xff]  ;;  %v2430_v23 = vld [vmem:[%s2961_s0 + $0x48] sm:$0xff] }
  0x15   :  { %v114_v18 = vunpack.c.l.b16 %v93_v13  ;;  %v2437_v25 = vld [vmem:[%s2961_s0 + $0xf8] sm:$0xff]  ;;  %v2445_v26 = vld [vmem:[%s2961_s0 + $0x40] sm:$0xff]  ;;  %v2451_v27 = vld [vmem:[%s2961_s0 + $0xf0] sm:$0xff]  ;;  %v2620_v56 = vsub.s32 %v173_v53, %v175_v54 }
  0x16   :  { %1783 = vmatpush3.bf16.msra.mxu0 %v2082_v2  ;;  %1803 = vmatpush3.xpose.msra.mxu1 %v2373_v6  ;;  %v116_v19 = vrot.slane %v115_v14, 7  ;;  %v2462_v28 = vld [vmem:[%s2961_s0 + $0x38] sm:$0xff]  ;;  %v2467_v29 = vld [vmem:[%s2961_s0 + $0xe8] sm:$0xff]  ;;  %v2476_v30 = vld [vmem:[%s2961_s0 + $0x30] sm:$0xff] }
  0x17   :  { %1784 = vmatprep.subr.bf16.mxu0 %v2267_v0  ;;  %1804 = vmatprep.subr.mxu1 %v2267_v0  ;;  %v2481_v31 = vld [vmem:[%s2961_s0 + $0xe0] sm:$0xff]  ;;  %v2493_v32 = vld [vmem:[%s2961_s0 + $0x28] sm:$0xff]  ;;  %v2499_v33 = vld [vmem:[%s2961_s0 + $0xd8] sm:$0xff] }
  0x18   :  { %v118_v22 = vsel %vm117_vm1, %v116_v19, %v114_v18  ;;  %v2507_v34 = vld [vmem:[%s2961_s0 + $0x20] sm:$0xff]  ;;  %v2513_v35 = vld [vmem:[%s2961_s0 + $0xd0] sm:$0xff]  ;;  %v2521_v36 = vld [vmem:[%s2961_s0 + $0x18] sm:$0xff] }
  0x19   :  { %v2432_v24 = vpack.c.b16 %v118_v22, %v118_v22  ;;  %v2527_v37 = vld [vmem:[%s2961_s0 + $0xc8] sm:$0xff]  ;;  %v2535_v38 = vld [vmem:[%s2961_s0 + $0x10] sm:$0xff]  ;;  %v2541_v39 = vld [vmem:[%s2961_s0 + $0xc0] sm:$0xff] }
  0x1a   :  { %1785 = vmatpush3.bf16.msra.mxu0 %v2083_v3  ;;  %1805 = vmatpush3.xpose.msra.mxu1 %v2387_v10  ;;  %v2550_v40 = vld [vmem:[%s2961_s0 + $0xb8] sm:$0xff]  ;;  %v2557_v41 = vld [vmem:[%s2961_s0 + $0xb0] sm:$0xff]  ;;  %v2564_v42 = vld [vmem:[%s2961_s0 + $0xa8] sm:$0xff] }
  0x1b   :  { %1786 = vmatprep.subr.bf16.mxu0 %v2267_v0  ;;  %1806 = vmatprep.subr.mxu1 %v2267_v0  ;;  %v2571_v43 = vld [vmem:[%s2961_s0 + $0xa0] sm:$0xff]  ;;  %v2578_v44 = vld [vmem:[%s2961_s0 + $0x98] sm:$0xff]  ;;  %v2585_v45 = vld [vmem:[%s2961_s0 + $0x90] sm:$0xff] }
  0x1c   :  { %v2592_v46 = vld [vmem:[%s2961_s0 + $0x8] sm:$0xff]  ;;  %v2605_v48 = vld [vmem:[%s2961_s0] sm:$0xff] }
  0x1d   :  { %v2598_v47 = vld [vmem:[%s2961_s0 + $0x88] sm:$0xff]  ;;  %v2612_v49 = vld [vmem:[%s2961_s0 + $0x80] sm:$0xff] }
  0x1e   :  { %1787 = vmatpush3.bf16.msra.mxu0 %v2084_v5  ;;  %1807 = vmatpush3.xpose.msra.mxu1 %v2401_v15  ;;  %v2089_v55 = vld [vmem:[%s2965_s4] ss:$0 sps:$4 sm:$0x11]  }
  0x1f   :  { %1788 = vmatprep.subr.bf16.mxu0 %v2267_v0  ;;  %1808 = vmatprep.subr.mxu1 %v2267_v0  ;;  %v177_v57 = vrot.slane %v2089_v55, %v2620_v56  ;;  %v2697_v7 = vld [vmem:[%s2963_s2] sm:$0x1]  ;;  %v2092_v55 = vld [vmem:[%s2968_s7 + $0xac] ss:$12 sps:$4 sm:$0xff]  }
  0x20   :  { %vm391_vm2 = vcmp.gt.f32.partialorder %v2697_v7, 0.0 }
  0x21   :  { %v184_v58 = vrot.slane %v177_v57, %v2620_v56 }
  0x22   :  { %1789 = vmatpush3.bf16.msra.mxu0 %v2085_v8  ;;  %1809 = vmatpush3.xpose.msra.mxu1 %v2410_v17  ;;  %v2702_v8 = vld [vmem:[%s2963_s2 + $0x1] sm:$0x1] }
  0x23   :  { %1790 = vmatprep.subr.bf16.mxu0 %v2267_v0  ;;  %1810 = vmatprep.subr.mxu1 %v2267_v0  ;;  %vm392_vm3 = vcmp.gt.f32.partialorder %v2702_v8, 0.0 }
  0x26   :  { %1791 = vmatpush3.bf16.msra.mxu0 %v2086_v12  ;;  %1811 = vmatpush3.xpose.msra.mxu1 %v2421_v21 }
  0x27   :  { %1792 = vmatprep.subr.bf16.mxu0 %v2267_v0  ;;  %1812 = vmatprep.subr.mxu1 %v2267_v0 }
  0x2a   :  { %1793 = vmatpush3.bf16.msra.mxu0 %v2087_v16  ;;  %1813 = vmatpush3.xpose.msra.mxu1 %v2430_v23 }
  0x2b   :  { %1794 = vmatprep.subr.bf16.mxu0 %v2267_v0  ;;  %1814 = vmatprep.subr.mxu1 %v2267_v0 }
  0x2e   :  { %1795 = vmatpush3.bf16.msra.mxu0 %v2088_v20  ;;  %1815 = vmatpush3.xpose.msra.mxu1 %v2445_v26 }
  0x2f   :  { %1835 = vmatprep.subr.mxu0 %v2267_v0  ;;  %1816 = vmatprep.subr.mxu1 %v2267_v0 }
  0x31   :  { %1797 = vmatmul.mubr.bf16.vlgmr.msra.gmra.mxu0 %v2432_v24 }
  0x32   :  { %1836 = vmatpush3.xpose.msra.mxu0 %v2437_v25  ;;  %1867 = vmatprep.mubr.msk.f32.mxu0 %vm2268_vm0, %v2267_v0 }
  0x33   :  { %1837 = vmatprep.subr.mxu0 %v2267_v0  ;;  %1817 = vmatpush3.xpose.msra.mxu1 %v2462_v28 }
  0x34   :  { %1818 = vmatprep.subr.mxu1 %v2267_v0 }
  0x36   :  { %1838 = vmatpush3.xpose.msra.mxu0 %v2451_v27 }
  0x37   :  { %1839 = vmatprep.subr.mxu0 %v2267_v0  ;;  %1819 = vmatpush3.xpose.msra.mxu1 %v2476_v30 }
  0x38   :  { %1820 = vmatprep.subr.mxu1 %v2267_v0 }
  0x3a   :  { %1840 = vmatpush3.xpose.msra.mxu0 %v2467_v29 }
  0x3b   :  { %1841 = vmatprep.subr.mxu0 %v2267_v0  ;;  %1821 = vmatpush3.xpose.msra.mxu1 %v2493_v32 }
  0x3c   :  { %1822 = vmatprep.subr.mxu1 %v2267_v0 }
  0x3e   :  { %1842 = vmatpush3.xpose.msra.mxu0 %v2481_v31 }
  0x3f   :  { %1843 = vmatprep.subr.mxu0 %v2267_v0  ;;  %1823 = vmatpush3.xpose.msra.mxu1 %v2507_v34 }
  0x40   :  { %1824 = vmatprep.subr.mxu1 %v2267_v0 }
  0x42   :  { %1844 = vmatpush3.xpose.msra.mxu0 %v2499_v33 }
  0x43   :  { %1845 = vmatprep.subr.mxu0 %v2267_v0  ;;  %1825 = vmatpush3.xpose.msra.mxu1 %v2521_v36 }
  0x44   :  { %1826 = vmatprep.subr.mxu1 %v2267_v0 }
  0x46   :  { %1846 = vmatpush3.xpose.msra.mxu0 %v2513_v35 }
  0x47   :  { %1847 = vmatprep.subr.mxu0 %v2267_v0  ;;  %1827 = vmatpush3.xpose.msra.mxu1 %v2535_v38 }
  0x48   :  { %1828 = vmatprep.subr.mxu1 %v2267_v0 }
  0x4a   :  { %1848 = vmatpush3.xpose.msra.mxu0 %v2527_v37 }
  0x4b   :  { %1849 = vmatprep.subr.mxu0 %v2267_v0  ;;  %1829 = vmatpush3.xpose.msra.mxu1 %v2592_v46 }
  0x4c   :  { %1830 = vmatprep.subr.mxu1 %v2267_v0 }
  0x4e   :  { %1850 = vmatpush3.xpose.msra.mxu0 %v2541_v39 }
  0x4f   :  { %1851 = vmatprep.subr.mxu0 %v2267_v0  ;;  %1831 = vmatpush3.xpose.msra.mxu1 %v2605_v48 }
  0x50   :  { %1870 = vmatprep.subr.mxu1 %v2267_v0 }
  0x52   :  { %1852 = vmatpush3.xpose.msra.mxu0 %v2550_v40 }
  0x53   :  { %1853 = vmatprep.subr.mxu0 %v2267_v0 }
  0x56   :  { %1854 = vmatpush3.xpose.msra.mxu0 %v2557_v41 }
  0x57   :  { %1855 = vmatprep.subr.mxu0 %v2267_v0 }
  0x5a   :  { %1856 = vmatpush3.xpose.msra.mxu0 %v2564_v42 }
  0x5b   :  { %1857 = vmatprep.subr.mxu0 %v2267_v0 }
  0x5e   :  { %1858 = vmatpush3.xpose.msra.mxu0 %v2571_v43 }
  0x5f   :  { %1859 = vmatprep.subr.mxu0 %v2267_v0 }
  0x62   :  { %1860 = vmatpush3.xpose.msra.mxu0 %v2578_v44 }
  0x63   :  { %1861 = vmatprep.subr.mxu0 %v2267_v0 }
  0x66   :  { %1862 = vmatpush3.xpose.msra.mxu0 %v2585_v45 }
  0x67   :  { %1863 = vmatprep.subr.mxu0 %v2267_v0 }
  0x6a   :  { %1864 = vmatpush3.xpose.msra.mxu0 %v2598_v47 }
  0x6b   :  { %1865 = vmatprep.subr.mxu0 %v2267_v0 }
  0x6e   :  { %1866 = vmatpush3.xpose.msra.mxu0 %v2612_v49 }
  0x6f   :  { %1905 = vmatprep.subr.mxu0 %v2267_v0 }
  0xf1   :  { %v220_v59 = vpop.f32.mrf.mxu0 }
  0xf2   :  { %v221_v60 = vadd.f32 %v220_v59, %v184_v58 }
  0xf3   :  { %v1798_v61 = vpop.f32.mrf.mxu0 }
  0xf4   :  { %v233_v62 = vrot.slane %v221_v60, %v2620_v56  ;;  %v2093_v60 = vld [vmem:[%s2968_s7 + $0xb0] ss:$12 sps:$4 sm:$0xff]  }
  0xf5   :  { %v223_v63 = vpop.f32.mrf.mxu0 }
  0xf6   :  { %v234_v1 = vcombine.high %v233_v62, %v233_v62  ;;  %v241_v2 = vrot.slane %v233_v62, %v2620_v56  ;;  %v2090_v63 = vld [vmem:[%s2968_s7 + $0xa8] ss:$12 sps:$4 sm:$0xff]  }
  0xf7   :  { %v1799_v3 = vpop.f32.mrf.mxu0 }
  0xf8   :  { %v248_v5 = vrot.slane %v234_v1, %v2620_v56  ;;  %1833 = vmatmul.mubr.f32.vlgmr.msra.gmra.mxu1 %v241_v2  ;;  %v2097_v1 = vld [vmem:[%s2968_s7 + $0x98] ss:$12 sps:$4 sm:$0xff]   ;;  %v2096_v3 = vld [vmem:[%s2968_s7 + $0x94] ss:$12 sps:$4 sm:$0xff]  }
  0xf9   :  { %1871 = vmatpush3.msra.mxu1 %v2363_v4  ;;  %1902 = vmatprep.mubr.msk.f32.mxu1 %vm2268_vm0, %v2267_v0 }
  0xfa   :  { %1868 = vmatmul.mubr.f32.vlgmr.msra.gmra.mxu0 %v248_v5  ;;  %1872 = vmatprep.subr.mxu1 %v2267_v0  ;;  %v2094_v5 = vld [vmem:[%s2968_s7 + $0x90] ss:$12 sps:$4 sm:$0xff]  }
  0xfb   :  { %1906 = vmatpush3.msra.mxu0 %v2437_v25  ;;  %1873 = vmatpush3.msra.mxu1 %v2373_v6 }
  0xfc   :  { %1907 = vmatprep.subr.mxu0 %v2267_v0  ;;  %1874 = vmatprep.subr.mxu1 %v2267_v0 }
  0xfd   :  { %1908 = vmatpush3.msra.mxu0 %v2451_v27  ;;  %1875 = vmatpush3.msra.mxu1 %v2387_v10 }
  0xfe   :  { %1909 = vmatprep.subr.mxu0 %v2267_v0  ;;  %1876 = vmatprep.subr.mxu1 %v2267_v0 }
  0xff   :  { %1910 = vmatpush3.msra.mxu0 %v2467_v29  ;;  %1877 = vmatpush3.msra.mxu1 %v2401_v15 }
 0x100   :  { %1911 = vmatprep.subr.mxu0 %v2267_v0  ;;  %1878 = vmatprep.subr.mxu1 %v2267_v0 }
 0x101   :  { %1912 = vmatpush3.msra.mxu0 %v2481_v31  ;;  %1879 = vmatpush3.msra.mxu1 %v2410_v17 }
 0x102   :  { %1913 = vmatprep.subr.mxu0 %v2267_v0  ;;  %1880 = vmatprep.subr.mxu1 %v2267_v0 }
 0x103   :  { %1914 = vmatpush3.msra.mxu0 %v2499_v33  ;;  %1881 = vmatpush3.msra.mxu1 %v2421_v21 }
 0x104   :  { %1915 = vmatprep.subr.mxu0 %v2267_v0  ;;  %1882 = vmatprep.subr.mxu1 %v2267_v0 }
 0x105   :  { %1916 = vmatpush3.msra.mxu0 %v2513_v35  ;;  %1883 = vmatpush3.msra.mxu1 %v2430_v23 }
 0x106   :  { %1917 = vmatprep.subr.mxu0 %v2267_v0  ;;  %1884 = vmatprep.subr.mxu1 %v2267_v0 }
 0x107   :  { %1918 = vmatpush3.msra.mxu0 %v2527_v37  ;;  %1885 = vmatpush3.msra.mxu1 %v2445_v26 }
 0x108   :  { %1919 = vmatprep.subr.mxu0 %v2267_v0  ;;  %1886 = vmatprep.subr.mxu1 %v2267_v0 }
 0x109   :  { %1920 = vmatpush3.msra.mxu0 %v2541_v39  ;;  %1887 = vmatpush3.msra.mxu1 %v2462_v28 }
 0x10a   :  { %1921 = vmatprep.subr.mxu0 %v2267_v0  ;;  %1888 = vmatprep.subr.mxu1 %v2267_v0 }
 0x10b   :  { %1922 = vmatpush3.msra.mxu0 %v2550_v40  ;;  %1889 = vmatpush3.msra.mxu1 %v2476_v30 }
 0x10c   :  { %1923 = vmatprep.subr.mxu0 %v2267_v0  ;;  %1890 = vmatprep.subr.mxu1 %v2267_v0 }
 0x10d   :  { %1924 = vmatpush3.msra.mxu0 %v2557_v41  ;;  %1891 = vmatpush3.msra.mxu1 %v2493_v32 }
 0x10e   :  { %1925 = vmatprep.subr.mxu0 %v2267_v0  ;;  %1892 = vmatprep.subr.mxu1 %v2267_v0 }
 0x10f   :  { %1926 = vmatpush3.msra.mxu0 %v2564_v42  ;;  %1893 = vmatpush3.msra.mxu1 %v2507_v34 }
 0x110   :  { %1927 = vmatprep.subr.mxu0 %v2267_v0  ;;  %1894 = vmatprep.subr.mxu1 %v2267_v0 }
 0x111   :  { %1928 = vmatpush3.msra.mxu0 %v2571_v43  ;;  %1895 = vmatpush3.msra.mxu1 %v2521_v36 }
 0x112   :  { %1929 = vmatprep.subr.mxu0 %v2267_v0  ;;  %1896 = vmatprep.subr.mxu1 %v2267_v0 }
 0x113   :  { %1930 = vmatpush3.msra.mxu0 %v2578_v44  ;;  %1897 = vmatpush3.msra.mxu1 %v2535_v38 }
 0x114   :  { %1931 = vmatprep.subr.mxu0 %v2267_v0  ;;  %1937 = vmatprep.mubr.msk.f32.mxu0 %vm2268_vm0, %v2267_v0 }
 0x115   :  { %1932 = vmatpush3.msra.mxu0 %v2585_v45  ;;  %1898 = vmatprep.subr.mxu1 %v2267_v0 }
 0x116   :  { %1933 = vmatprep.subr.mxu0 %v2267_v0  ;;  %1899 = vmatpush3.msra.mxu1 %v2592_v46 }
 0x117   :  { %1934 = vmatpush3.msra.mxu0 %v2598_v47  ;;  %1900 = vmatprep.subr.mxu1 %v2267_v0 }
 0x118   :  { %1935 = vmatprep.subr.mxu0 %v2267_v0  ;;  %1901 = vmatpush3.msra.mxu1 %v2605_v48 }
 0x119   :  { %1936 = vmatpush3.msra.mxu0 %v2612_v49  ;;  %759 = vmatprep.subr.bf16.mxu1 %v2092_v55  ;;  %v2124_v55 = vld [vmem:[#allocation2 + $0xac] ss:$12 sps:$4 sm:$0xff]  }
 0x11a   :  { %1940 = vmatprep.subr.bf16.mxu0 %v2267_v0 }
 0x1b8   :  { %v317_v9 = vpop.f32.mrf.mxu1 }
 0x1b9   :  { %v393_v11 = vsel %vm391_vm2, -inf, %v317_v9  ;;  %v2101_v9 = vld [vmem:[%s2968_s7 + $0x80] ss:$12 sps:$4 sm:$0xff]  }
 0x1ba   :  { %395 = vst [vmem:[#allocation5] sm:$0x1] %v393_v11  ;;  %v1834_v12 = vpop.f32.mrf.mxu1  ;;  %v387_v13 = vpop.f32.mrf.mxu0  ;;  %v398_v19 = vsel %vm397_vm4, %v393_v11, -inf }
 0x1bb   :  { %v394_v14 = vsel %vm392_vm3, -inf, %v387_v13  ;;  %v2098_v12 = vld [vmem:[%s2968_s7 + $0x78] ss:$12 sps:$4 sm:$0xff]   ;;  %v2105_v13 = vld [vmem:[%s2968_s7 + $0x68] ss:$12 sps:$4 sm:$0xff]  }
 0x1bc   :  { %396 = vst [vmem:[#allocation5 + $0x1] sm:$0x1] %v394_v14  ;;  %v1869_v16 = vpop.f32.mrf.mxu0  ;;  %v401_v18 = vsel %vm397_vm4, %v394_v14, -inf }
 0x1bd   :  { %402 = vmax.xlane.f32.xlu0 %v401_v18  ;;  %v2102_v16 = vld [vmem:[%s2968_s7 + $0x60] ss:$12 sps:$4 sm:$0xff]   ;;  %v2109_v18 = vld [vmem:[%s2968_s7 + $0x50] ss:$12 sps:$4 sm:$0xff]  }
 0x1c1   :  { %399 = vmax.xlane.f32.xlu0 %v398_v19  ;;  %v2108_v19 = vld [vmem:[%s2968_s7 + $0x4c] ss:$12 sps:$4 sm:$0xff]  }
 0x246   :  { %v403_v20 = vpop.xlane.xlu0 %402 }
 0x247   :  { %v405_v22 = vsub.f32 %v394_v14, %v403_v20  ;;  %v2104_v14 = vld [vmem:[%s2968_s7 + $0x64] ss:$12 sps:$4 sm:$0xff]   ;;  %v2106_v20 = vld [vmem:[%s2968_s7 + $0x48] ss:$12 sps:$4 sm:$0xff]  }
 0x249   :  { %v408_v25 = vmul.f32 1.442695, %v405_v22  ;;  %v2112_v22 = vld [vmem:[%s2968_s7 + $0x34] ss:$12 sps:$4 sm:$0xff]  }
 0x24a   :  { %v400_v27 = vpop.xlane.xlu0 %399 }
 0x24b   :  { %2165 = vpow2.f32 %v408_v25  ;;  %v404_v29 = vsub.f32 %v393_v11, %v400_v27  ;;  %v2100_v11 = vld [vmem:[%s2968_s7 + $0x7c] ss:$12 sps:$4 sm:$0xff]   ;;  %v2113_v27 = vld [vmem:[%s2968_s7 + $0x38] ss:$12 sps:$4 sm:$0xff]  }
 0x24c   :  { %v2110_v25 = vld [vmem:[%s2968_s7 + $0x30] ss:$12 sps:$4 sm:$0xff]  }
 0x24d   :  { %v406_v50 = vmul.f32 1.442695, %v404_v29  ;;  %v2116_v29 = vld [vmem:[%s2968_s7 + $0x1c] ss:$12 sps:$4 sm:$0xff]  }
 0x24f   :  { %2167 = vpow2.f32 %v406_v50  ;;  %v2114_v50 = vld [vmem:[%s2968_s7 + $0x18] ss:$12 sps:$4 sm:$0xff]  }
 0x258   :  { %v2166_v51 = vpop.eup %2165 }
 0x259   :  { %v413_v52 = vsel %vm397_vm4, %v2166_v51, 0.0 }
 0x25a   :  { %414 = vadd.xlane.f32.xlu1 %v413_v52  ;;  %v2120_v52 = vld [vmem:[%s2968_s7 + $0x4] ss:$12 sps:$4 sm:$0xff]  }
 0x25c   :  { %v2168_v53 = vpop.eup %2167 }
 0x25d   :  { %v410_v54 = vsel %vm397_vm4, %v2168_v53, 0.0 }
 0x25e   :  { %411 = vadd.xlane.f32.xlu1 %v410_v54  ;;  %v2121_v54 = vld [vmem:[%s2968_s7 + $0x8] ss:$12 sps:$4 sm:$0xff]  }
 0x2e3   :  { %v415_v57 = vpop.xlane.xlu1 %414 }
 0x2e4   :  { %2169 = vrcp.f32 %v415_v57  ;;  %v2270_v57 = vmov 0  }
 0x2e7   :  { %v412_v58 = vpop.xlane.xlu1 %411 }
 0x2e8   :  { %2171 = vrcp.f32 %v412_v58 }
 0x2f1   :  { %v2170_v59 = vpop.eup %2169 }
 0x2f2   :  { %v419_v61 = vmul.f32 %v2170_v59, %v2166_v51  ;;  %v2117_v51 = vld [vmem:[%s2968_s7 + $0x20] ss:$12 sps:$4 sm:$0xff]  }
 0x2f4   :  { %1938 = vmatmul.mubr.f32.vlgmr.msra.gmra.mxu0 %v419_v61 }
 0x2f5   :  { %v2172_v62 = vpop.eup %2171  ;;  %1941 = vmatpush3.bf16.msra.mxu0 %v2093_v60  ;;  %1956 = vmatprep.mubr.msk.bf16.mxu0 %vm2268_vm0, %v2267_v0 }
 0x2f6   :  { %v418_v2 = vmul.f32 %v2172_v62, %v2168_v53  ;;  %1942 = vmatprep.subr.bf16.mxu0 %v2267_v0  ;;  %v2118_v53 = vld [vmem:[%s2968_s7] ss:$12 sps:$4 sm:$0xff]  }
 0x2f8   :  { %1903 = vmatmul.mubr.f32.vlgmr.msra.gmra.mxu1 %v418_v2 }
 0x2f9   :  { %760 = vmatpush1.bf16.msra.mxu1 %v2090_v63  ;;  %1943 = vmatpush3.bf16.msra.mxu0 %v2097_v1 }
 0x2fa   :  { %761 = vmatprep.subr.bf16.mxu1 %v2096_v3  ;;  %1944 = vmatprep.subr.bf16.mxu0 %v2267_v0 }
 0x2fb   :  { %791 = vmatprep.mubr.bf16.mxu1 %v2270_v57 }
 0x2fd   :  { %762 = vmatpush1.bf16.msra.mxu1 %v2094_v5  ;;  %1945 = vmatpush3.bf16.msra.mxu0 %v2101_v9  ;;  %v2122_v9 = vld [vmem:[#allocation2 + $0xa8] ss:$12 sps:$4 sm:$0xff]  }
 0x2fe   :  { %763 = vmatprep.subr.bf16.mxu1 %v2100_v11  ;;  %1946 = vmatprep.subr.bf16.mxu0 %v2267_v0  ;;  %v2125_v11 = vld [vmem:[#allocation2 + $0xb0] ss:$12 sps:$4 sm:$0xff]  }
 0x301   :  { %764 = vmatpush1.bf16.msra.mxu1 %v2098_v12  ;;  %1947 = vmatpush3.bf16.msra.mxu0 %v2105_v13  ;;  %v2128_v13 = vld [vmem:[#allocation2 + $0x94] ss:$12 sps:$4 sm:$0xff]  }
 0x302   :  { %765 = vmatprep.subr.bf16.mxu1 %v2104_v14  ;;  %1948 = vmatprep.subr.bf16.mxu0 %v2267_v0  ;;  %v2126_v14 = vld [vmem:[#allocation2 + $0x90] ss:$12 sps:$4 sm:$0xff]  }
 0x305   :  { %766 = vmatpush1.bf16.msra.mxu1 %v2102_v16  ;;  %1949 = vmatpush3.bf16.msra.mxu0 %v2109_v18  ;;  %v2129_v16 = vld [vmem:[#allocation2 + $0x98] ss:$12 sps:$4 sm:$0xff]   ;;  %v2132_v18 = vld [vmem:[#allocation2 + $0x7c] ss:$12 sps:$4 sm:$0xff]  }
 0x306   :  { %767 = vmatprep.subr.bf16.mxu1 %v2108_v19  ;;  %1950 = vmatprep.subr.bf16.mxu0 %v2267_v0  ;;  %v2130_v19 = vld [vmem:[#allocation2 + $0x78] ss:$12 sps:$4 sm:$0xff]  }
 0x309   :  { %768 = vmatpush1.bf16.msra.mxu1 %v2106_v20  ;;  %1951 = vmatpush3.bf16.msra.mxu0 %v2113_v27  ;;  %v2133_v20 = vld [vmem:[#allocation2 + $0x80] ss:$12 sps:$4 sm:$0xff]   ;;  %v2137_v27 = vld [vmem:[#allocation2 + $0x68] ss:$12 sps:$4 sm:$0xff]  }
 0x30a   :  { %769 = vmatprep.subr.bf16.mxu1 %v2112_v22  ;;  %1952 = vmatprep.subr.bf16.mxu0 %v2267_v0  ;;  %v2136_v22 = vld [vmem:[#allocation2 + $0x64] ss:$12 sps:$4 sm:$0xff]  }
 0x30d   :  { %770 = vmatpush1.bf16.msra.mxu1 %v2110_v25  ;;  %1953 = vmatpush3.bf16.msra.mxu0 %v2117_v51  ;;  %v2134_v25 = vld [vmem:[#allocation2 + $0x60] ss:$12 sps:$4 sm:$0xff]   ;;  %v2141_v51 = vld [vmem:[#allocation2 + $0x50] ss:$12 sps:$4 sm:$0xff]  }
 0x30e   :  { %771 = vmatprep.subr.bf16.mxu1 %v2116_v29  ;;  %1954 = vmatprep.subr.bf16.mxu0 %v2267_v0  ;;  %v2140_v29 = vld [vmem:[#allocation2 + $0x4c] ss:$12 sps:$4 sm:$0xff]  }
 0x311   :  { %772 = vmatpush1.bf16.msra.mxu1 %v2114_v50  ;;  %1955 = vmatpush3.bf16.msra.mxu0 %v2121_v54  ;;  %v2138_v50 = vld [vmem:[#allocation2 + $0x48] ss:$12 sps:$4 sm:$0xff]   ;;  %v2145_v54 = vld [vmem:[#allocation2 + $0x38] ss:$12 sps:$4 sm:$0xff]  }
 0x312   :  { %773 = vmatprep.subr.bf16.mxu1 %v2120_v52  ;;  %1960 = vmatprep.subr.bf16.mxu0 %v2267_v0  ;;  %v2144_v52 = vld [vmem:[#allocation2 + $0x34] ss:$12 sps:$4 sm:$0xff]  }
 0x315   :  { %774 = vmatpush1.bf16.msra.mxu1 %v2118_v53  ;;  %v2142_v53 = vld [vmem:[#allocation2 + $0x30] ss:$12 sps:$4 sm:$0xff]  }
 0x316   :  { %1065 = vmatprep.subr.bf16.mxu1 %v2124_v55  ;;  %v2148_v55 = vld [vmem:[#allocation2 + $0x1c] ss:$12 sps:$4 sm:$0xff]  }
 0x3b4   :  { %v556_v58 = vpop.f32.mrf.mxu0 }
 0x3b5   :  { %v561_v59 = vpack.c.bf16 %v556_v58, %v556_v58  ;;  %v2149_v58 = vld [vmem:[#allocation2 + $0x20] ss:$12 sps:$4 sm:$0xff]  }
 0x3b6   :  { %v1939_v60 = vpop.f32.mrf.mxu0 }
 0x3b7   :  { %v598_v61 = vunpack.c.l.b16 %v561_v59  ;;  %v2152_v59 = vld [vmem:[#allocation2 + $0x4] ss:$12 sps:$4 sm:$0xff]   ;;  %v2150_v60 = vld [vmem:[#allocation2] ss:$12 sps:$4 sm:$0xff]  }
 0x3b8   :  { %v486_v62 = vpop.f32.mrf.mxu1 }
 0x3b9   :  { %v560_v63 = vpack.c.bf16 %v486_v62, %v486_v62  ;;  %v599_v2 = vrot.slane %v598_v61, 7  ;;  %v2153_v61 = vld [vmem:[#allocation2 + $0x8] ss:$12 sps:$4 sm:$0xff]  }
 0x3ba   :  { %v1904_v1 = vpop.f32.mrf.mxu1 }
 0x3bb   :  { %v597_v3 = vunpack.c.l.b16 %v560_v63  ;;  %v2155_v1 = vld [vmem:[%s2971_s10] ss:$0 sps:$4 sm:$0x77]  }
 0x3bd   :  { %v600_v5 = vsel %vm117_vm1, %v599_v2, %v597_v3  ;;  %v1045_v3 = vrot.slane %v2155_v1, %v2620_v56 }
 0x3be   :  { %v601_v12 = vpack.c.b16 %v600_v5, %v600_v5 }
 0x3c0   :  { %792 = vmatmul.mubr.bf16.vlgmr.msra.gmra.mxu1 %v601_v12  ;;  %1957 = vmatmul.mubr.bf16.vlgmr.msra.gmra.mxu0 %v601_v12  ;;  %v1046_v12 = vcombine.high %v1045_v3, %v1045_v3 }
 0x3c1   :  { %1066 = vmatpush1.bf16.msra.mxu1 %v2122_v9  ;;  %1961 = vmatpush3.bf16.msra.mxu0 %v2125_v11  ;;  %v1053_v11 = vrot.slane %v1045_v3, %v2620_v56 }
 0x3c2   :  { %1067 = vmatprep.subr.bf16.mxu1 %v2128_v13  ;;  %1962 = vmatprep.subr.bf16.mxu0 %v2267_v0 }
 0x3c3   :  { %1097 = vmatprep.mubr.bf16.mxu1 %v2270_v57  ;;  %1976 = vmatprep.mubr.msk.bf16.mxu0 %vm2268_vm0, %v2267_v0  ;;  %v2146_v57 = vld [vmem:[#allocation2 + $0x18] ss:$12 sps:$4 sm:$0xff]  }
 0x3c5   :  { %1068 = vmatpush1.bf16.msra.mxu1 %v2126_v14  ;;  %1963 = vmatpush3.bf16.msra.mxu0 %v2129_v16  ;;  %v1061_v16 = vcombine.high %v1053_v11, %v1053_v11 }
 0x3c6   :  { %1069 = vmatprep.subr.bf16.mxu1 %v2132_v18  ;;  %1964 = vmatprep.subr.bf16.mxu0 %v2267_v0 }
 0x3c9   :  { %1070 = vmatpush1.bf16.msra.mxu1 %v2130_v19  ;;  %1965 = vmatpush3.bf16.msra.mxu0 %v2133_v20  ;;  %v1060_v19 = vrot.slane %v1046_v12, %v2620_v56 }
 0x3ca   :  { %1071 = vmatprep.subr.bf16.mxu1 %v2136_v22  ;;  %1966 = vmatprep.subr.bf16.mxu0 %v2267_v0 }
 0x3cd   :  { %1072 = vmatpush1.bf16.msra.mxu1 %v2134_v25  ;;  %1967 = vmatpush3.bf16.msra.mxu0 %v2137_v27 }
 0x3ce   :  { %1073 = vmatprep.subr.bf16.mxu1 %v2140_v29  ;;  %1968 = vmatprep.subr.bf16.mxu0 %v2267_v0 }
 0x3d1   :  { %1074 = vmatpush1.bf16.msra.mxu1 %v2138_v50  ;;  %1969 = vmatpush3.bf16.msra.mxu0 %v2141_v51 }
 0x3d2   :  { %1075 = vmatprep.subr.bf16.mxu1 %v2144_v52  ;;  %1970 = vmatprep.subr.bf16.mxu0 %v2267_v0 }
 0x3d5   :  { %1076 = vmatpush1.bf16.msra.mxu1 %v2142_v53  ;;  %1971 = vmatpush3.bf16.msra.mxu0 %v2145_v54 }
 0x3d6   :  { %1077 = vmatprep.subr.bf16.mxu1 %v2148_v55  ;;  %1972 = vmatprep.subr.bf16.mxu0 %v2267_v0 }
 0x3d9   :  { %1078 = vmatpush1.bf16.msra.mxu1 %v2146_v57  ;;  %1973 = vmatpush3.bf16.msra.mxu0 %v2149_v58 }
 0x3da   :  { %1079 = vmatprep.subr.bf16.mxu1 %v2152_v59  ;;  %1974 = vmatprep.subr.bf16.mxu0 %v2267_v0 }
 0x3dd   :  { %1080 = vmatpush1.bf16.msra.mxu1 %v2150_v60  ;;  %1975 = vmatpush3.bf16.msra.mxu0 %v2153_v61 }
 0x3de   :  { %1980 = vmatprep.subr.bf16.mxu1 %v2267_v0  ;;  %2000 = vmatprep.subr.mxu0 %v2267_v0 }
 0x3e0   :  { %1098 = vmatmul.mubr.bf16.vlgmr.msra.gmra.mxu1 %v2432_v24  ;;  %1977 = vmatmul.mubr.bf16.vlgmr.msra.gmra.mxu0 %v2432_v24  ;;  %v2163_v24 = vld [vmem:[%s2966_s5] sm:$0xff]  }
 0x3e1   :  { %1996 = vmatprep.mubr.msk.bf16.mxu1 %vm2268_vm0, %v2267_v0  ;;  %2001 = vmatpush3.xpose.msra.mxu0 %v2363_v4  ;;  %v2156_v4 = vld [vmem:[%s2966_s5 + $0x38] sm:$0xff]  }
 0x3e2   :  { %2002 = vmatprep.subr.mxu0 %v2267_v0  ;;  %2032 = vmatprep.mubr.msk.f32.mxu0 %vm2268_vm0, %v2267_v0 }
 0x3e3   :  { %1981 = vmatpush3.bf16.msra.mxu1 %v2156_v4 }
 0x3e4   :  { %1982 = vmatprep.subr.bf16.mxu1 %v2267_v0 }
 0x3e5   :  { %2003 = vmatpush3.xpose.msra.mxu0 %v2373_v6  ;;  %v2157_v6 = vld [vmem:[%s2966_s5 + $0x30] sm:$0xff]  }
 0x3e6   :  { %2004 = vmatprep.subr.mxu0 %v2267_v0 }
 0x3e7   :  { %1983 = vmatpush3.bf16.msra.mxu1 %v2157_v6 }
 0x3e8   :  { %1984 = vmatprep.subr.bf16.mxu1 %v2267_v0 }
 0x3e9   :  { %2005 = vmatpush3.xpose.msra.mxu0 %v2387_v10  ;;  %v2158_v10 = vld [vmem:[%s2966_s5 + $0x28] sm:$0xff]  }
 0x3ea   :  { %2006 = vmatprep.subr.mxu0 %v2267_v0 }
 0x3eb   :  { %1985 = vmatpush3.bf16.msra.mxu1 %v2158_v10 }
 0x3ec   :  { %1986 = vmatprep.subr.bf16.mxu1 %v2267_v0 }
 0x3ed   :  { %2007 = vmatpush3.xpose.msra.mxu0 %v2401_v15  ;;  %v2159_v15 = vld [vmem:[%s2966_s5 + $0x20] sm:$0xff]  }
 0x3ee   :  { %2008 = vmatprep.subr.mxu0 %v2267_v0 }
 0x3ef   :  { %1987 = vmatpush3.bf16.msra.mxu1 %v2159_v15 }
 0x3f0   :  { %1988 = vmatprep.subr.bf16.mxu1 %v2267_v0 }
 0x3f1   :  { %2009 = vmatpush3.xpose.msra.mxu0 %v2410_v17  ;;  %v2160_v17 = vld [vmem:[%s2966_s5 + $0x18] sm:$0xff]  }
 0x3f2   :  { %2010 = vmatprep.subr.mxu0 %v2267_v0 }
 0x3f3   :  { %1989 = vmatpush3.bf16.msra.mxu1 %v2160_v17 }
 0x3f4   :  { %1990 = vmatprep.subr.bf16.mxu1 %v2267_v0 }
 0x3f5   :  { %2011 = vmatpush3.xpose.msra.mxu0 %v2421_v21  ;;  %v2161_v21 = vld [vmem:[%s2966_s5 + $0x10] sm:$0xff]  }
 0x3f6   :  { %2012 = vmatprep.subr.mxu0 %v2267_v0 }
 0x3f7   :  { %1991 = vmatpush3.bf16.msra.mxu1 %v2161_v21 }
 0x3f8   :  { %1992 = vmatprep.subr.bf16.mxu1 %v2267_v0 }
 0x3f9   :  { %2013 = vmatpush3.xpose.msra.mxu0 %v2430_v23  ;;  %v2162_v23 = vld [vmem:[%s2966_s5 + $0x8] sm:$0xff]  }
 0x3fa   :  { %2014 = vmatprep.subr.mxu0 %v2267_v0 }
 0x3fb   :  { %1993 = vmatpush3.bf16.msra.mxu1 %v2162_v23 }
 0x3fc   :  { %1994 = vmatprep.subr.bf16.mxu1 %v2267_v0 }
 0x3fd   :  { %2015 = vmatpush3.xpose.msra.mxu0 %v2445_v26 }
 0x3fe   :  { %2016 = vmatprep.subr.mxu0 %v2267_v0 }
 0x3ff   :  { %1995 = vmatpush3.bf16.msra.mxu1 %v2163_v24 }
 0x400   :  { %2035 = vmatprep.subr.mxu1 %v2267_v0 }
 0x401   :  { %2017 = vmatpush3.xpose.msra.mxu0 %v2462_v28 }
 0x402   :  { %2018 = vmatprep.subr.mxu0 %v2267_v0 }
 0x405   :  { %2019 = vmatpush3.xpose.msra.mxu0 %v2476_v30 }
 0x406   :  { %2020 = vmatprep.subr.mxu0 %v2267_v0 }
 0x409   :  { %2021 = vmatpush3.xpose.msra.mxu0 %v2493_v32 }
 0x40a   :  { %2022 = vmatprep.subr.mxu0 %v2267_v0 }
 0x40d   :  { %2023 = vmatpush3.xpose.msra.mxu0 %v2507_v34 }
 0x40e   :  { %2024 = vmatprep.subr.mxu0 %v2267_v0 }
 0x411   :  { %2025 = vmatpush3.xpose.msra.mxu0 %v2521_v36 }
 0x412   :  { %2026 = vmatprep.subr.mxu0 %v2267_v0 }
 0x415   :  { %2027 = vmatpush3.xpose.msra.mxu0 %v2535_v38 }
 0x416   :  { %2028 = vmatprep.subr.mxu0 %v2267_v0 }
 0x419   :  { %2029 = vmatpush3.xpose.msra.mxu0 %v2592_v46 }
 0x41a   :  { %2030 = vmatprep.subr.mxu0 %v2267_v0 }
 0x41d   :  { %2031 = vmatpush3.xpose.msra.mxu0 %v2605_v48  ;;  %v2154_v48 = vld [vmem:[%s2970_s9] ss:$0 sps:$4 sm:$0x77]  }
 0x41e   :  { %v739_v62 = vrot.slane %v2154_v48, %v2620_v56 }
 0x420   :  { %v740_v63 = vcombine.high %v739_v62, %v739_v62  ;;  %v747_v5 = vrot.slane %v739_v62, %v2620_v56 }
 0x422   :  { %v754_v2 = vrot.slane %v740_v63, %v2620_v56  ;;  %v755_v14 = vcombine.high %v747_v5, %v747_v5 }
 0x480   :  { %v793_v26 = vpop.f32.mrf.mxu1  ;;  %v834_v28 = vpop.f32.mrf.mxu0 }
 0x481   :  { %v794_v13 = vadd.f32 %v793_v26, %v747_v5  ;;  %v835_v25 = vadd.f32 %v834_v28, %v755_v14 }
 0x482   :  { %v795_v30 = vpop.f32.mrf.mxu1  ;;  %v1958_v32 = vpop.f32.mrf.mxu0 }
 0x483   :  { %v796_v9 = vadd.f32 %v795_v30, %v754_v2  ;;  %v857_v57 = vrot.slane %v835_v25, %v2620_v56 }
 0x484   :  { %v797_v34 = vpop.f32.mrf.mxu1  ;;  %v837_v36 = vpop.f32.mrf.mxu0 }
 0x485   :  { %v843_v18 = vcombine.low %v794_v13, %v796_v9 }
 0x486   :  { %v798_v38 = vpop.f32.mrf.mxu1  ;;  %v1959_v46 = vpop.f32.mrf.mxu0 }
 0x487   :  { %v850_v51 = vrot.slane %v843_v18, %v2620_v56 }
 0x489   :  { %v858_v4 = vcombine.low %v850_v51, %v857_v57  ;;  %v859_v6 = vcombine.high %v850_v51, %v857_v57 }
 0x48b   :  { %v866_v21 = vrot.slane %v858_v4, %v2620_v56  ;;  %v873_v23 = vrot.slane %v859_v6, %v2620_v56 }
 0x48d   :  { %v1196_v46 = vrot.slane %v866_v21, 1  ;;  %v1197_v48 = vrot.slane %v873_v23, 1  ;;  %v1224_v25 = vrot.slane %v866_v21, 2 }
 0x4a0   :  { %v1099_v20 = vpop.f32.mrf.mxu1  ;;  %v1140_v22 = vpop.f32.mrf.mxu0 }
 0x4a1   :  { %v1141_v27 = vadd.f32 %v1140_v22, %v1061_v16  ;;  %v1100_v52 = vadd.f32 %v1099_v20, %v1053_v11 }
 0x4a2   :  { %v1101_v29 = vpop.f32.mrf.mxu1  ;;  %v1978_v50 = vpop.f32.mrf.mxu0 }
 0x4a3   :  { %v1102_v53 = vadd.f32 %v1101_v29, %v1060_v19  ;;  %v1163_v58 = vrot.slane %v1141_v27, %v2620_v56  ;;  %v1225_v29 = vrot.slane %v873_v23, 2 }
 0x4a4   :  { %v1103_v54 = vpop.f32.mrf.mxu1  ;;  %v1143_v55 = vpop.f32.mrf.mxu0 }
 0x4a5   :  { %v1149_v59 = vcombine.low %v1100_v52, %v1102_v53 }
 0x4a6   :  { %v1104_v60 = vpop.f32.mrf.mxu1  ;;  %v1979_v61 = vpop.f32.mrf.mxu0 }
 0x4a7   :  { %v1156_v10 = vrot.slane %v1149_v59, %v2620_v56  ;;  %v2193_v61 = vld [vmem:[%s2962_s1] sm:$0x1] }
 0x4a9   :  { %v1164_v15 = vcombine.low %v1156_v10, %v1163_v58  ;;  %v1165_v17 = vcombine.high %v1156_v10, %v1163_v58  ;;  %v2194_v10 = vld [vmem:[%s2962_s1 + $0x1] sm:$0x1] }
 0x4ab   :  { %v1172_v24 = vrot.slane %v1164_v15, %v2620_v56  ;;  %v1179_v26 = vrot.slane %v1165_v17, %v2620_v56 }
 0x4ad   :  { %v1182_v28 = vadd.f32 %v1172_v24, %v866_v21  ;;  %v1183_v30 = vadd.f32 %v1179_v26, %v873_v23  ;;  %v1200_v36 = vrot.slane %v1172_v24, 1  ;;  %v1201_v38 = vrot.slane %v1179_v26, 1 }
 0x4ae   :  { %v1218_v18 = vrot.slane %v1172_v24, 2  ;;  %v1219_v20 = vrot.slane %v1179_v26, 2 }
 0x4af   :  { %v1630_v32 = vmul.f32 -1.442695, %v1182_v28  ;;  %v1631_v34 = vmul.f32 -1.442695, %v1183_v30  ;;  %v1204_v62 = vadd.f32 %v1200_v36, %v1196_v46  ;;  %v1205_v63 = vadd.f32 %v1201_v38, %v1197_v48  ;;  %v2195_v36 = vld [vmem:[%s2961_s0 + $0xf8] sm:$0xff]  ;;  %v2196_v38 = vld [vmem:[%s2961_s0 + $0xf0] sm:$0xff] }
 0x4b0   :  { %v2197_v46 = vld [vmem:[%s2961_s0 + $0xe8] sm:$0xff] }
 0x4b1   :  { %2173 = vpow2.f32 %v1630_v32  ;;  %v1632_v1 = vmul.f32 -1.442695, %v1204_v62  ;;  %v1633_v2 = vmul.f32 -1.442695, %v1205_v63 }
 0x4b2   :  { %2175 = vpow2.f32 %v1631_v34 }
 0x4b3   :  { %2177 = vpow2.f32 %v1632_v1 }
 0x4b4   :  { %2179 = vpow2.f32 %v1633_v2 }
 0x4be   :  { %v2174_v3 = vpop.eup %2173 }
 0x4bf   :  { %v2176_v5 = vpop.eup %2175  ;;  %v1190_v9 = vadd.f32 1.0, %v2174_v3 }
 0x4c0   :  { %v1191_v11 = vadd.f32 1.0, %v2176_v5  ;;  %v2178_v12 = vpop.eup %2177 }
 0x4c1   :  { %2181 = vrcp.f32 %v1190_v9  ;;  %v2180_v13 = vpop.eup %2179  ;;  %v1212_v14 = vadd.f32 1.0, %v2178_v12 }
 0x4c2   :  { %2183 = vrcp.f32 %v1191_v11  ;;  %v1213_v16 = vadd.f32 1.0, %v2180_v13 }
 0x4c3   :  { %2185 = vrcp.f32 %v1212_v14 }
 0x4c4   :  { %2187 = vrcp.f32 %v1213_v16 }
 0x4ce   :  { %v2182_v19 = vpop.eup %2181 }
 0x4cf   :  { %v2184_v22 = vpop.eup %2183  ;;  %v1222_v27 = vmul.f32 %v2182_v19, %v1218_v18 }
 0x4d0   :  { %v1223_v50 = vmul.f32 %v2184_v22, %v1219_v20  ;;  %v2186_v53 = vpop.eup %2185 }
 0x4d1   :  { %v1228_v51 = vadd.f32 %v1224_v25, %v1222_v27  ;;  %v2188_v54 = vpop.eup %2187  ;;  %v1232_v55 = vsub.f32 1.0, %v2186_v53  ;;  %v1236_v4 = vmul.f32 %v2193_v61, %v2186_v53 }
 0x4d2   :  { %v1229_v52 = vadd.f32 %v1225_v29, %v1223_v50  ;;  %v1233_v58 = vsub.f32 1.0, %v2188_v54  ;;  %v1237_v15 = vmul.f32 %v2194_v10, %v2188_v54 }
 0x4d3   :  { %2189 = vtanh.f32 %v1228_v51 }
 0x4d4   :  { %2191 = vtanh.f32 %v1229_v52 }
 0x4e0   :  { %v2190_v57 = vpop.eup %2189 }
 0x4e1   :  { %v2192_v59 = vpop.eup %2191  ;;  %v1234_v60 = vmul.f32 %v2190_v57, %v1232_v55 }
 0x4e2   :  { %v1235_v6 = vmul.f32 %v2192_v59, %v1233_v58 }
 0x4e3   :  { %v1238_v17 = vadd.f32 %v1236_v4, %v1234_v60 }
 0x4e4   :  { %v1239_v21 = vadd.f32 %v1237_v15, %v1235_v6 }
 0x4e5   :  { %v1240_v23 = vpack.c.bf16 %v1238_v17, %v1238_v17 }
 0x4e6   :  { %v1241_v24 = vpack.c.bf16 %v1239_v21, %v1239_v21 }
 0x4e7   :  { %v1261_v28 = vunpack.c.l.b16 %v1240_v23 }
 0x4e8   :  { %v1262_v26 = vunpack.c.l.b16 %v1241_v24 }
 0x4ea   :  { %v1263_v30 = vrot.slane %v1262_v26, 7 }
 0x4ec   :  { %v1264_v32 = vsel %vm117_vm1, %v1263_v30, %v1261_v28 }
 0x4ed   :  { %v1265_v34 = vpack.c.b16 %v1264_v32, %v1264_v32 }
 0x4ef   :  { %1997 = vmatmul.mubr.bf16.vlgmr.msra.gmra.mxu1 %v1265_v34 }
 0x4f0   :  { %2036 = vmatpush3.xpose.msra.mxu1 %v2195_v36  ;;  %2067 = vmatprep.mubr.msk.f32.mxu1 %vm2268_vm0, %v2267_v0 }
 0x4f1   :  { %2037 = vmatprep.subr.mxu1 %v2267_v0 }
 0x4f4   :  { %2038 = vmatpush3.xpose.msra.mxu1 %v2196_v38 }
 0x4f5   :  { %2039 = vmatprep.subr.mxu1 %v2267_v0 }
 0x4f8   :  { %2040 = vmatpush3.xpose.msra.mxu1 %v2197_v46 }
 0x4f9   :  { %2041 = vmatprep.subr.mxu1 %v2267_v0 }
 0x4fc   :  { %2042 = vmatpush3.xpose.msra.mxu1 %v2481_v31  ;;  %v2164_v31 = vld [vmem:[%s2967_s6] ss:$0 sps:$4 sm:$0x11]   ;;  %s1546_s6 = sshll.u32 %s2271_s24, 4  ;;  %s1547_s6 = int_to_ptr.vmem [resolvable:$true] %s1546_s6 }
 0x4fd   :  { %2043 = vmatprep.subr.mxu1 %v2267_v0  ;;  %s2218_s25 = scalar_lea.vmem %s1547_s6, 32  ;;  %p2223_p6 = scmp.lt.s32.totalorder %s1547_s6, %s1547_s6 }
 0x4fe   :  { %p2219_p5 = scmp.ne.s32.totalorder %s1547_s6, %s2218_s25  ;;  %p2224_p7 = scmp.lt.s32.totalorder %s2218_s25, %s2218_s25 }
 0x500   :  { %2044 = vmatpush3.xpose.msra.mxu1 %v2499_v33  ;;  %v1323_v33 = vrot.slane %v2164_v31, %v2620_v56  ;;  %p2225_p8 = por %p2224_p7, %p2223_p6 }
 0x501   :  { %2045 = vmatprep.subr.mxu1 %v2267_v0 }
 0x502   :  { %p2226_p9 = pnand %p2225_p8, %p2219_p5 }
 0x504   :  { %2046 = vmatpush3.xpose.msra.mxu1 %v2513_v35  ;;  %v1330_v35 = vrot.slane %v1323_v33, %v2620_v56 }
 0x505   :  { %2047 = vmatprep.subr.mxu1 %v2267_v0 }
 0x508   :  { %2048 = vmatpush3.xpose.msra.mxu1 %v2527_v37 }
 0x509   :  { %2049 = vmatprep.subr.mxu1 %v2267_v0 }
 0x50c   :  { %2050 = vmatpush3.xpose.msra.mxu1 %v2541_v39 }
 0x50d   :  { %2051 = vmatprep.subr.mxu1 %v2267_v0 }
 0x510   :  { %2052 = vmatpush3.xpose.msra.mxu1 %v2550_v40 }
 0x511   :  { %2053 = vmatprep.subr.mxu1 %v2267_v0 }
 0x514   :  { %2054 = vmatpush3.xpose.msra.mxu1 %v2557_v41 }
 0x515   :  { %2055 = vmatprep.subr.mxu1 %v2267_v0 }
 0x518   :  { %2056 = vmatpush3.xpose.msra.mxu1 %v2564_v42 }
 0x519   :  { %2057 = vmatprep.subr.mxu1 %v2267_v0 }
 0x51c   :  { %2058 = vmatpush3.xpose.msra.mxu1 %v2571_v43 }
 0x51d   :  { %2059 = vmatprep.subr.mxu1 %v2267_v0 }
 0x520   :  { %2060 = vmatpush3.xpose.msra.mxu1 %v2578_v44 }
 0x521   :  { %2061 = vmatprep.subr.mxu1 %v2267_v0 }
 0x524   :  { %2062 = vmatpush3.xpose.msra.mxu1 %v2585_v45 }
 0x525   :  { %2063 = vmatprep.subr.mxu1 %v2267_v0 }
 0x528   :  { %2064 = vmatpush3.xpose.msra.mxu1 %v2598_v47 }
 0x529   :  { %2065 = vmatprep.subr.mxu1 %v2267_v0 }
 0x52c   :  { %2066 = vmatpush3.xpose.msra.mxu1 %v2612_v49 }
 0x5af   :  { %v1366_v37 = vpop.f32.mrf.mxu1 }
 0x5b0   :  { %v1367_v39 = vadd.f32 %v1366_v37, %v1330_v35 }
 0x5b1   :  { %v1998_v40 = vpop.f32.mrf.mxu1 }
 0x5b2   :  { %v1379_v41 = vrot.slane %v1367_v39, %v2620_v56 }
 0x5b3   :  { %v1369_v42 = vpop.f32.mrf.mxu1 }
 0x5b4   :  { %v1380_v43 = vcombine.high %v1379_v41, %v1379_v41  ;;  %v1387_v44 = vrot.slane %v1379_v41, %v2620_v56 }
 0x5b5   :  { %v1999_v0 = vpop.f32.mrf.mxu1 }
 0x5b6   :  { %v1394_v45 = vrot.slane %v1380_v43, %v2620_v56  ;;  %2033 = vmatmul.mubr.f32.vlgmr.msra.gmra.mxu0 %v1387_v44 }
 0x5b8   :  { %2068 = vmatmul.mubr.f32.vlgmr.msra.gmra.mxu1 %v1394_v45 }
 0x5b9   :  { %2229 = shalt.err (!%p2226_p9)
}
 0x5ba   :  { %s2272_s26 = smov 16   ;;  %s2273_s27 = smov 1  }
 0x5bb   :  { %1552 = dma.vmem_to_hbm [thread:$0]  %s1547_s6, 32, %s2972_s11, [#allocation4], %s2272_s26, %s2272_s26, %s2273_s27  }
 0x5bc   :  { %s2274_s8 = smov [#allocation6]  }
 0x5bd   :  { %s1558_s30 = sshll.u32 %s2274_s8, 4  ;;  %s1559_s30 = int_to_ptr.vmem [resolvable:$true] %s1558_s30 }
 0x5be   :  { %s2238_s13 = scalar_lea.vmem %s1559_s30, 32  ;;  %p2243_p11 = scmp.lt.s32.totalorder %s1559_s30, %s1559_s30 }
 0x5bf   :  { %p2239_p10 = scmp.ne.s32.totalorder %s1559_s30, %s2238_s13  ;;  %p2244_p12 = scmp.lt.s32.totalorder %s2238_s13, %s2238_s13 }
 0x5c1   :  { %p2245_p13 = por %p2244_p12, %p2243_p11 }
 0x5c3   :  { %p2246_p0 = pnand %p2245_p13, %p2239_p10 }
 0x676   :  { %v1463_v47 = vpop.f32.mrf.mxu0 }
 0x677   :  { %v1537_v49 = vsel %vm391_vm2, -inf, %v1463_v47 }
 0x678   :  { %1539 = vst [vmem:[#allocation6] sm:$0x1] %v1537_v49  ;;  %v2034_v56 = vpop.f32.mrf.mxu0  ;;  %v1533_v48 = vpop.f32.mrf.mxu1 }
 0x679   :  { %v1538_v62 = vsel %vm392_vm3, -inf, %v1533_v48 }
 0x67a   :  { %1540 = vst [vmem:[#allocation6 + $0x1] sm:$0x1] %v1538_v62  ;;  %v2069_v63 = vpop.f32.mrf.mxu1 }
 0x67b   :  { %2249 = shalt.err (!%p2246_p0)
}
 0x67c   :  { %1564 = dma.vmem_to_hbm [thread:$0]  %s1559_s30, 32, %s2973_s12, [#allocation7], %s2272_s26, %s2272_s26, %s2273_s27  }
 0x67d   :  { %2260 = dma.done.wait [#allocation4], 32  }
 0x67e   :  { %2261 = vsyncadd [#allocation4], 4294967264 }
 0x67f   :  { %2262 = dma.done.wait [#allocation7], 32  }
 0x680   :  { %2263 = vsyncadd [#allocation7], 4294967264 }
 0x681   :  { %1571 = vsyncpa [#allocation3], 1 }
 0x682   :  { %1572 = vsyncpa [#allocation4], 1 }
 0x683   :  { %1573 = vsyncpa [#allocation7], 1 }

</bundles_post_ra>
